<compile_context>
chip_gen: v5e
topology: v5e:2x2
jax: 0.10.0
libtpu: 0.0.40
codegen_flags: <defaults>
</compile_context>

<pallas_src>
import jax
import jax.numpy as jnp
from jax.experimental import pallas as pl
from jax.experimental.pallas import tpu as pltpu

_VMEM_LIMIT = 32 * 1024 * 1024  # safe scoped-VMEM ceiling on v5e / v6e / v7x


def _round_up(x, m):
    return (x + m - 1) // m * m


# ---------------------------------------------------------------------------
# Pallas kernels
# ---------------------------------------------------------------------------
def _conv_gemm_relu_kernel(w_ref, b_ref, p_ref, o_ref):
    # w_ref: (Cout, K) bf16      p_ref: (K, TILE_M) bf16
    # b_ref: (Cout, 1) f32       o_ref: (Cout, TILE_M) bf16  (lane-dense store)
    acc = jnp.dot(w_ref[...], p_ref[...], preferred_element_type=jnp.float32)
    acc = acc + b_ref[...]                      # per-channel bias, broadcast over lanes
    o_ref[...] = jnp.maximum(acc, 0.0).astype(o_ref.dtype)


def _mlp_kernel(x_ref, w1_ref, b1_ref, w2_ref, b2_ref, o_ref):
    # x_ref: (TB, F) bf16   w1: (F, H1) bf16   w2: (H1, Dout) bf16
    # b1: (1, H1) f32       b2: (1, Dout) f32  o_ref: (TB, Dout) f32
    h = jnp.dot(x_ref[...], w1_ref[...], preferred_element_type=jnp.float32)
    h = jnp.maximum(h + b1_ref[...], 0.0)
    y = jnp.dot(h.astype(w2_ref.dtype), w2_ref[...], preferred_element_type=jnp.float32)
    o_ref[...] = (y + b2_ref[...]).astype(o_ref.dtype)


# ---------------------------------------------------------------------------
# Conv2d(k=3, s=2, p=0) + ReLU on (C, N, H, W) bf16 activations
# ---------------------------------------------------------------------------
def conv3x3_s2_relu(x_cnhw, w_gemm, b_col):
    c, n, h, w = x_cnhw.shape
    cout, k = w_gemm.shape
    ho, wo = (h - 3) // 2 + 1, (w - 3) // 2 + 1
    m = n * ho * wo

    # im2col (stride-2, valid): 9 strided views, tap-major / channel-minor rows
    # to match the (Cout, kh, kw, Cin) flattening of the weight.
    taps = []
    for kh in range(3):
        for kw in range(3):
            taps.append(
                x_cnhw[:, :, kh:kh + 2 * ho - 1:2, kw:kw + 2 * wo - 1:2].reshape(c, m))
    p = jnp.concatenate(taps, axis=0)  # (K, M) bf16

    tile_m = min(1024, _round_up(m, 128))
    m_pad = _round_up(m, tile_m)
    if m_pad != m:
        p = jnp.pad(p, ((0, 0), (0, m_pad - m)))

    out = pl.pallas_call(
        _conv_gemm_relu_kernel,
        out_shape=jax.ShapeDtypeStruct((cout, m_pad), jnp.bfloat16),
        grid=(m_pad // tile_m,),
        in_specs=[
            pl.BlockSpec((cout, k), lambda i: (0, 0)),    # weight: resident across grid
            pl.BlockSpec((cout, 1), lambda i: (0, 0)),    # bias:   resident across grid
            pl.BlockSpec((k, tile_m), lambda i: (0, i)),  # patches: tiled over M
        ],
        out_specs=pl.BlockSpec((cout, tile_m), lambda i: (0, i)),
        compiler_params=pltpu.CompilerParams(
            dimension_semantics=("parallel",),
            vmem_limit_bytes=_VMEM_LIMIT,
        ),
        cost_estimate=pl.CostEstimate(
            flops=2 * m_pad * k * cout,
            transcendentals=0,
            bytes_accessed=2 * (k * m_pad + cout * k + cout * m_pad) + 4 * cout,
        ),
    )(w_gemm, b_col, p)

    return out[:, :m].reshape(cout, n, ho, wo)


# ---------------------------------------------------------------------------
# Fused MLP head: Linear -> ReLU -> Linear, tiled over batch
# ---------------------------------------------------------------------------
def mlp_head(x_flat, w1, b1, w2, b2):
    b, f = x_flat.shape
    h1 = w1.shape[1]
    dout = w2.shape[1]

    tb = min(256, _round_up(b, 8))
    bp = _round_up(b, tb)
    if bp != b:
        x_flat = jnp.pad(x_flat, ((0, bp - b), (0, 0)))

    out = pl.pallas_call(
        _mlp_kernel,
        out_shape=jax.ShapeDtypeStruct((bp, dout), jnp.float32),
        grid=(bp // tb,),
        in_specs=[
            pl.BlockSpec((tb, f), lambda i: (i, 0)),
            pl.BlockSpec((f, h1), lambda i: (0, 0)),
            pl.BlockSpec((1, h1), lambda i: (0, 0)),
            pl.BlockSpec((h1, dout), lambda i: (0, 0)),
            pl.BlockSpec((1, dout), lambda i: (0, 0)),
        ],
        out_specs=pl.BlockSpec((tb, dout), lambda i: (i, 0)),
        compiler_params=pltpu.CompilerParams(
            dimension_semantics=("parallel",),
            vmem_limit_bytes=_VMEM_LIMIT,
        ),
        cost_estimate=pl.CostEstimate(
            flops=2 * bp * (f * h1 + h1 * dout),
            transcendentals=0,
            bytes_accessed=2 * (bp * f + f * h1 + h1 * dout) + 4 * (h1 + dout + bp * dout),
        ),
    )(x_flat, w1, b1, w2, b2)
    return out[:b]


# ---------------------------------------------------------------------------
# Parameters (GEMM layout / bf16 prepared once, outside the jitted forward)
# ---------------------------------------------------------------------------
def init_encoder_params(key, width, height, channel):
    conv_dims = [(channel, 32), (32, 32), (32, 64), (64, 64)]
    keys = jax.random.split(key, 2 * len(conv_dims) + 4)
    params = {}
    for li, (cin, cout) in enumerate(conv_dims):
        fan_in = cin * 9
        bound = 1.0 / (fan_in ** 0.5)
        w = jax.random.uniform(keys[2 * li], (cout, cin, 3, 3), jnp.float32, -bound, bound)
        b = jax.random.uniform(keys[2 * li + 1], (cout,), jnp.float32, -bound, bound)
        # (Cout, Cin, kh, kw) -> (Cout, kh, kw, Cin) -> (Cout, 9*Cin), cast to bf16 once.
        w_gemm = jnp.transpose(w, (0, 2, 3, 1)).reshape(cout, 9 * cin).astype(jnp.bfloat16)
        params[f"conv{li}"] = (w_gemm, b.reshape(cout, 1))

    wf, hf = width, height
    for _ in range(4):
        wf, hf = (wf - 1) // 2, (hf - 1) // 2
    feat = 64 * wf * hf

    k1, k2, k3, k4 = keys[-4:]
    bound1 = 1.0 / (feat ** 0.5)
    w1 = jax.random.uniform(k1, (feat, 256), jnp.float32, -bound1, bound1).astype(jnp.bfloat16)
    b1 = jax.random.uniform(k2, (1, 256), jnp.float32, -bound1, bound1)
    bound2 = 1.0 / (256.0 ** 0.5)
    w2 = jax.random.uniform(k3, (256, 64), jnp.float32, -bound2, bound2).astype(jnp.bfloat16)
    b2 = jax.random.uniform(k4, (1, 64), jnp.float32, -bound2, bound2)
    params["mlp"] = (w1, b1, w2, b2)
    return params


# ---------------------------------------------------------------------------
# EncoderNet forward
# ---------------------------------------------------------------------------
@jax.jit
def encoder_forward(params, x_nchw):
    # NCHW -> (C, N, H, W), bf16 activations feeding the MXU (f32 accumulate in-kernel).
    x = jnp.transpose(x_nchw, (1, 0, 2, 3)).astype(jnp.bfloat16)
    for li in range(4):
        wg, bc = params[f"conv{li}"]
        x = conv3x3_s2_relu(x, wg, bc)
    c, n, h, w = x.shape
    # PyTorch x.view(B, -1) flattens NCHW order: (C,N,H,W) -> (N,C,H,W) -> (N, C*H*W)
    x_flat = jnp.transpose(x, (1, 0, 2, 3)).reshape(n, c * h * w)
    return mlp_head(x_flat, *params["mlp"])


if __name__ == "__main__":
    key = jax.random.PRNGKey(0)
    kp, kx = jax.random.split(key)

    # spatial=32 so that four stride-2 valid convs leave a 1x1 feature map
    # (spatial=16 would collapse to 0 in the original module).
    batch, channel, height, width = 2, 4, 32, 32

    params = init_encoder_params(kp, width, height, channel)
    x = jax.random.normal(kx, (batch, channel, height, width), jnp.float32)

    y = encoder_forward(params, x)
    y = jax.block_until_ready(y)

    assert y.shape == (batch, 64), y.shape
    assert bool(jnp.all(jnp.isfinite(y)))
    print("KERNEL_OK")
</pallas_src>

<mosaic_0001>
module attributes {stable_mosaic.version = 11 : i64} {
  func.func @_conv_gemm_relu_kernel(%arg0: i32, %arg1: memref<32x36xbf16, #tpu.memory_space<vmem>>, %arg2: memref<32x1xf32, #tpu.memory_space<vmem>>, %arg3: memref<36x512xbf16, #tpu.memory_space<vmem>>, %arg4: memref<32x512xbf16, #tpu.memory_space<vmem>>) attributes {dimension_semantics = [#tpu.dimension_semantics<parallel>], iteration_bounds = array<i64: 1>, scalar_prefetch = 0 : i64, scratch_operands = 0 : i64, tpu.core_type = #tpu.core_type<tc>, window_params = [{pipeline_mode = #tpu.pipeline_mode<synchronous>, transform_indices = @transform_0, window_bounds = array<i64: 32, 36>}, {pipeline_mode = #tpu.pipeline_mode<synchronous>, transform_indices = @transform_1, window_bounds = array<i64: 32, 1>}, {transform_indices = @transform_2, window_bounds = array<i64: 36, 512>}, {transform_indices = @transform_3, window_bounds = array<i64: 32, 512>}]} {
    %c0 = arith.constant 0 : index
    %c0_0 = arith.constant 0 : index
    %0 = vector.load %arg1[%c0, %c0_0] : memref<32x36xbf16, #tpu.memory_space<vmem>>, vector<32x36xbf16>
    %c0_1 = arith.constant 0 : index
    %c0_2 = arith.constant 0 : index
    %1 = vector.load %arg3[%c0_1, %c0_2] : memref<36x512xbf16, #tpu.memory_space<vmem>>, vector<36x512xbf16>
    %cst = arith.constant dense<0.000000e+00> : vector<32x512xf32>
    %2 = tpu.matmul %0, %1, %cst {dimension_numbers = #tpu.dot_dimension_numbers<[1], [0], [0], [1], [0, 0, 1, 1], [], []>} : vector<32x36xbf16>, vector<36x512xbf16>, vector<32x512xf32> -> vector<32x512xf32>
    %c0_3 = arith.constant 0 : index
    %c0_4 = arith.constant 0 : index
    %3 = vector.load %arg2[%c0_3, %c0_4] : memref<32x1xf32, #tpu.memory_space<vmem>>, vector<32x1xf32>
    %4 = vector.broadcast %3 : vector<32x1xf32> to vector<32x512xf32>
    %5 = arith.addf %2, %4 : vector<32x512xf32>
    %cst_5 = arith.constant 0.000000e+00 : f32
    %6 = vector.broadcast %cst_5 : f32 to vector<32x512xf32>
    %7 = arith.maximumf %5, %6 : vector<32x512xf32>
    %8 = arith.truncf %7 : vector<32x512xf32> to vector<32x512xbf16>
    %c0_6 = arith.constant 0 : index
    %c0_7 = arith.constant 0 : index
    %9 = vector.load %arg4[%c0_6, %c0_7] : memref<32x512xbf16, #tpu.memory_space<vmem>>, vector<32x512xbf16>
    tpu.vector_store %arg4[%c0_6, %c0_7], %8 {strides = array<i32>} : memref<32x512xbf16, #tpu.memory_space<vmem>>, vector<32x512xbf16>,
    return
  }
  func.func @transform_0(%arg0: i32) -> (i32, i32) {
    %c0_i32 = arith.constant 0 : i32
    %c0_i32_0 = arith.constant 0 : i32
    %c0_i32_1 = arith.constant 0 : i32
    return %c0_i32, %c0_i32_0 : i32, i32
  }
  func.func @transform_1(%arg0: i32) -> (i32, i32) {
    %c0_i32 = arith.constant 0 : i32
    %c0_i32_0 = arith.constant 0 : i32
    %c0_i32_1 = arith.constant 0 : i32
    return %c0_i32, %c0_i32_0 : i32, i32
  }
  func.func @transform_2(%arg0: i32) -> (i32, i32) {
    %c0_i32 = arith.constant 0 : i32
    %c0_i32_0 = arith.constant 0 : i32
    return %c0_i32, %arg0 : i32, i32
  }
  func.func @transform_3(%arg0: i32) -> (i32, i32) {
    %c0_i32 = arith.constant 0 : i32
    %c0_i32_0 = arith.constant 0 : i32
    return %c0_i32, %arg0 : i32, i32
  }
}

module attributes {stable_mosaic.version = 11 : i64} {
  func.func @_conv_gemm_relu_kernel(%arg0: i32, %arg1: memref<32x288xbf16, #tpu.memory_space<vmem>>, %arg2: memref<32x1xf32, #tpu.memory_space<vmem>>, %arg3: memref<288x128xbf16, #tpu.memory_space<vmem>>, %arg4: memref<32x128xbf16, #tpu.memory_space<vmem>>) attributes {dimension_semantics = [#tpu.dimension_semantics<parallel>], iteration_bounds = array<i64: 1>, scalar_prefetch = 0 : i64, scratch_operands = 0 : i64, tpu.core_type = #tpu.core_type<tc>, window_params = [{pipeline_mode = #tpu.pipeline_mode<synchronous>, transform_indices = @transform_0, window_bounds = array<i64: 32, 288>}, {pipeline_mode = #tpu.pipeline_mode<synchronous>, transform_indices = @transform_1, window_bounds = array<i64: 32, 1>}, {transform_indices = @transform_2, window_bounds = array<i64: 288, 128>}, {transform_indices = @transform_3, window_bounds = array<i64: 32, 128>}]} {
    %c0 = arith.constant 0 : index
    %c0_0 = arith.constant 0 : index
    %0 = vector.load %arg1[%c0, %c0_0] : memref<32x288xbf16, #tpu.memory_space<vmem>>, vector<32x288xbf16>
    %c0_1 = arith.constant 0 : index
    %c0_2 = arith.constant 0 : index
    %1 = vector.load %arg3[%c0_1, %c0_2] : memref<288x128xbf16, #tpu.memory_space<vmem>>, vector<288x128xbf16>
    %cst = arith.constant dense<0.000000e+00> : vector<32x128xf32>
    %2 = tpu.matmul %0, %1, %cst {dimension_numbers = #tpu.dot_dimension_numbers<[1], [0], [0], [1], [0, 0, 1, 1], [], []>} : vector<32x288xbf16>, vector<288x128xbf16>, vector<32x128xf32> -> vector<32x128xf32>
    %c0_3 = arith.constant 0 : index
    %c0_4 = arith.constant 0 : index
    %3 = vector.load %arg2[%c0_3, %c0_4] : memref<32x1xf32, #tpu.memory_space<vmem>>, vector<32x1xf32>
    %4 = vector.broadcast %3 : vector<32x1xf32> to vector<32x128xf32>
    %5 = arith.addf %2, %4 : vector<32x128xf32>
    %cst_5 = arith.constant 0.000000e+00 : f32
    %6 = vector.broadcast %cst_5 : f32 to vector<32x128xf32>
    %7 = arith.maximumf %5, %6 : vector<32x128xf32>
    %8 = arith.truncf %7 : vector<32x128xf32> to vector<32x128xbf16>
    %c0_6 = arith.constant 0 : index
    %c0_7 = arith.constant 0 : index
    %9 = vector.load %arg4[%c0_6, %c0_7] : memref<32x128xbf16, #tpu.memory_space<vmem>>, vector<32x128xbf16>
    tpu.vector_store %arg4[%c0_6, %c0_7], %8 {strides = array<i32>} : memref<32x128xbf16, #tpu.memory_space<vmem>>, vector<32x128xbf16>,
    return
  }
  func.func @transform_0(%arg0: i32) -> (i32, i32) {
    %c0_i32 = arith.constant 0 : i32
    %c0_i32_0 = arith.constant 0 : i32
    %c0_i32_1 = arith.constant 0 : i32
    return %c0_i32, %c0_i32_0 : i32, i32
  }
  func.func @transform_1(%arg0: i32) -> (i32, i32) {
    %c0_i32 = arith.constant 0 : i32
    %c0_i32_0 = arith.constant 0 : i32
    %c0_i32_1 = arith.constant 0 : i32
    return %c0_i32, %c0_i32_0 : i32, i32
  }
  func.func @transform_2(%arg0: i32) -> (i32, i32) {
    %c0_i32 = arith.constant 0 : i32
    %c0_i32_0 = arith.constant 0 : i32
    return %c0_i32, %arg0 : i32, i32
  }
  func.func @transform_3(%arg0: i32) -> (i32, i32) {
    %c0_i32 = arith.constant 0 : i32
    %c0_i32_0 = arith.constant 0 : i32
    return %c0_i32, %arg0 : i32, i32
  }
}

module attributes {stable_mosaic.version = 11 : i64} {
  func.func @_conv_gemm_relu_kernel(%arg0: i32, %arg1: memref<64x288xbf16, #tpu.memory_space<vmem>>, %arg2: memref<64x1xf32, #tpu.memory_space<vmem>>, %arg3: memref<288x128xbf16, #tpu.memory_space<vmem>>, %arg4: memref<64x128xbf16, #tpu.memory_space<vmem>>) attributes {dimension_semantics = [#tpu.dimension_semantics<parallel>], iteration_bounds = array<i64: 1>, scalar_prefetch = 0 : i64, scratch_operands = 0 : i64, tpu.core_type = #tpu.core_type<tc>, window_params = [{pipeline_mode = #tpu.pipeline_mode<synchronous>, transform_indices = @transform_0, window_bounds = array<i64: 64, 288>}, {pipeline_mode = #tpu.pipeline_mode<synchronous>, transform_indices = @transform_1, window_bounds = array<i64: 64, 1>}, {transform_indices = @transform_2, window_bounds = array<i64: 288, 128>}, {transform_indices = @transform_3, window_bounds = array<i64: 64, 128>}]} {
    %c0 = arith.constant 0 : index
    %c0_0 = arith.constant 0 : index
    %0 = vector.load %arg1[%c0, %c0_0] : memref<64x288xbf16, #tpu.memory_space<vmem>>, vector<64x288xbf16>
    %c0_1 = arith.constant 0 : index
    %c0_2 = arith.constant 0 : index
    %1 = vector.load %arg3[%c0_1, %c0_2] : memref<288x128xbf16, #tpu.memory_space<vmem>>, vector<288x128xbf16>
    %cst = arith.constant dense<0.000000e+00> : vector<64x128xf32>
    %2 = tpu.matmul %0, %1, %cst {dimension_numbers = #tpu.dot_dimension_numbers<[1], [0], [0], [1], [0, 0, 1, 1], [], []>} : vector<64x288xbf16>, vector<288x128xbf16>, vector<64x128xf32> -> vector<64x128xf32>
    %c0_3 = arith.constant 0 : index
    %c0_4 = arith.constant 0 : index
    %3 = vector.load %arg2[%c0_3, %c0_4] : memref<64x1xf32, #tpu.memory_space<vmem>>, vector<64x1xf32>
    %4 = vector.broadcast %3 : vector<64x1xf32> to vector<64x128xf32>
    %5 = arith.addf %2, %4 : vector<64x128xf32>
    %cst_5 = arith.constant 0.000000e+00 : f32
    %6 = vector.broadcast %cst_5 : f32 to vector<64x128xf32>
    %7 = arith.maximumf %5, %6 : vector<64x128xf32>
    %8 = arith.truncf %7 : vector<64x128xf32> to vector<64x128xbf16>
    %c0_6 = arith.constant 0 : index
    %c0_7 = arith.constant 0 : index
    %9 = vector.load %arg4[%c0_6, %c0_7] : memref<64x128xbf16, #tpu.memory_space<vmem>>, vector<64x128xbf16>
    tpu.vector_store %arg4[%c0_6, %c0_7], %8 {strides = array<i32>} : memref<64x128xbf16, #tpu.memory_space<vmem>>, vector<64x128xbf16>,
    return
  }
  func.func @transform_0(%arg0: i32) -> (i32, i32) {
    %c0_i32 = arith.constant 0 : i32
    %c0_i32_0 = arith.constant 0 : i32
    %c0_i32_1 = arith.constant 0 : i32
    return %c0_i32, %c0_i32_0 : i32, i32
  }
  func.func @transform_1(%arg0: i32) -> (i32, i32) {
    %c0_i32 = arith.constant 0 : i32
    %c0_i32_0 = arith.constant 0 : i32
    %c0_i32_1 = arith.constant 0 : i32
    return %c0_i32, %c0_i32_0 : i32, i32
  }
  func.func @transform_2(%arg0: i32) -> (i32, i32) {
    %c0_i32 = arith.constant 0 : i32
    %c0_i32_0 = arith.constant 0 : i32
    return %c0_i32, %arg0 : i32, i32
  }
  func.func @transform_3(%arg0: i32) -> (i32, i32) {
    %c0_i32 = arith.constant 0 : i32
    %c0_i32_0 = arith.constant 0 : i32
    return %c0_i32, %arg0 : i32, i32
  }
}

module attributes {stable_mosaic.version = 11 : i64} {
  func.func @_conv_gemm_relu_kernel(%arg0: i32, %arg1: memref<64x576xbf16, #tpu.memory_space<vmem>>, %arg2: memref<64x1xf32, #tpu.memory_space<vmem>>, %arg3: memref<576x128xbf16, #tpu.memory_space<vmem>>, %arg4: memref<64x128xbf16, #tpu.memory_space<vmem>>) attributes {dimension_semantics = [#tpu.dimension_semantics<parallel>], iteration_bounds = array<i64: 1>, scalar_prefetch = 0 : i64, scratch_operands = 0 : i64, tpu.core_type = #tpu.core_type<tc>, window_params = [{pipeline_mode = #tpu.pipeline_mode<synchronous>, transform_indices = @transform_0, window_bounds = array<i64: 64, 576>}, {pipeline_mode = #tpu.pipeline_mode<synchronous>, transform_indices = @transform_1, window_bounds = array<i64: 64, 1>}, {transform_indices = @transform_2, window_bounds = array<i64: 576, 128>}, {transform_indices = @transform_3, window_bounds = array<i64: 64, 128>}]} {
    %c0 = arith.constant 0 : index
    %c0_0 = arith.constant 0 : index
    %0 = vector.load %arg1[%c0, %c0_0] : memref<64x576xbf16, #tpu.memory_space<vmem>>, vector<64x576xbf16>
    %c0_1 = arith.constant 0 : index
    %c0_2 = arith.constant 0 : index
    %1 = vector.load %arg3[%c0_1, %c0_2] : memref<576x128xbf16, #tpu.memory_space<vmem>>, vector<576x128xbf16>
    %cst = arith.constant dense<0.000000e+00> : vector<64x128xf32>
    %2 = tpu.matmul %0, %1, %cst {dimension_numbers = #tpu.dot_dimension_numbers<[1], [0], [0], [1], [0, 0, 1, 1], [], []>} : vector<64x576xbf16>, vector<576x128xbf16>, vector<64x128xf32> -> vector<64x128xf32>
    %c0_3 = arith.constant 0 : index
    %c0_4 = arith.constant 0 : index
    %3 = vector.load %arg2[%c0_3, %c0_4] : memref<64x1xf32, #tpu.memory_space<vmem>>, vector<64x1xf32>
    %4 = vector.broadcast %3 : vector<64x1xf32> to vector<64x128xf32>
    %5 = arith.addf %2, %4 : vector<64x128xf32>
    %cst_5 = arith.constant 0.000000e+00 : f32
    %6 = vector.broadcast %cst_5 : f32 to vector<64x128xf32>
    %7 = arith.maximumf %5, %6 : vector<64x128xf32>
    %8 = arith.truncf %7 : vector<64x128xf32> to vector<64x128xbf16>
    %c0_6 = arith.constant 0 : index
    %c0_7 = arith.constant 0 : index
    %9 = vector.load %arg4[%c0_6, %c0_7] : memref<64x128xbf16, #tpu.memory_space<vmem>>, vector<64x128xbf16>
    tpu.vector_store %arg4[%c0_6, %c0_7], %8 {strides = array<i32>} : memref<64x128xbf16, #tpu.memory_space<vmem>>, vector<64x128xbf16>,
    return
  }
  func.func @transform_0(%arg0: i32) -> (i32, i32) {
    %c0_i32 = arith.constant 0 : i32
    %c0_i32_0 = arith.constant 0 : i32
    %c0_i32_1 = arith.constant 0 : i32
    return %c0_i32, %c0_i32_0 : i32, i32
  }
  func.func @transform_1(%arg0: i32) -> (i32, i32) {
    %c0_i32 = arith.constant 0 : i32
    %c0_i32_0 = arith.constant 0 : i32
    %c0_i32_1 = arith.constant 0 : i32
    return %c0_i32, %c0_i32_0 : i32, i32
  }
  func.func @transform_2(%arg0: i32) -> (i32, i32) {
    %c0_i32 = arith.constant 0 : i32
    %c0_i32_0 = arith.constant 0 : i32
    return %c0_i32, %arg0 : i32, i32
  }
  func.func @transform_3(%arg0: i32) -> (i32, i32) {
    %c0_i32 = arith.constant 0 : i32
    %c0_i32_0 = arith.constant 0 : i32
    return %c0_i32, %arg0 : i32, i32
  }
}

module attributes {stable_mosaic.version = 11 : i64} {
  func.func @_mlp_kernel(%arg0: i32, %arg1: memref<8x64xbf16, #tpu.memory_space<vmem>>, %arg2: memref<64x256xbf16, #tpu.memory_space<vmem>>, %arg3: memref<1x256xf32, #tpu.memory_space<vmem>>, %arg4: memref<256x64xbf16, #tpu.memory_space<vmem>>, %arg5: memref<1x64xf32, #tpu.memory_space<vmem>>, %arg6: memref<8x64xf32, #tpu.memory_space<vmem>>) attributes {dimension_semantics = [#tpu.dimension_semantics<parallel>], iteration_bounds = array<i64: 1>, scalar_prefetch = 0 : i64, scratch_operands = 0 : i64, tpu.core_type = #tpu.core_type<tc>, window_params = [{transform_indices = @transform_0, window_bounds = array<i64: 8, 64>}, {pipeline_mode = #tpu.pipeline_mode<synchronous>, transform_indices = @transform_1, window_bounds = array<i64: 64, 256>}, {pipeline_mode = #tpu.pipeline_mode<synchronous>, transform_indices = @transform_2, window_bounds = array<i64: 1, 256>}, {pipeline_mode = #tpu.pipeline_mode<synchronous>, transform_indices = @transform_3, window_bounds = array<i64: 256, 64>}, {pipeline_mode = #tpu.pipeline_mode<synchronous>, transform_indices = @transform_4, window_bounds = array<i64: 1, 64>}, {transform_indices = @transform_5, window_bounds = array<i64: 8, 64>}]} {
    %c0 = arith.constant 0 : index
    %c0_0 = arith.constant 0 : index
    %0 = vector.load %arg1[%c0, %c0_0] : memref<8x64xbf16, #tpu.memory_space<vmem>>, vector<8x64xbf16>
    %c0_1 = arith.constant 0 : index
    %c0_2 = arith.constant 0 : index
    %1 = vector.load %arg2[%c0_1, %c0_2] : memref<64x256xbf16, #tpu.memory_space<vmem>>, vector<64x256xbf16>
    %cst = arith.constant dense<0.000000e+00> : vector<8x256xf32>
    %2 = tpu.matmul %0, %1, %cst {dimension_numbers = #tpu.dot_dimension_numbers<[1], [0], [0], [1], [0, 0, 1, 1], [], []>} : vector<8x64xbf16>, vector<64x256xbf16>, vector<8x256xf32> -> vector<8x256xf32>
    %c0_3 = arith.constant 0 : index
    %c0_4 = arith.constant 0 : index
    %3 = vector.load %arg3[%c0_3, %c0_4] : memref<1x256xf32, #tpu.memory_space<vmem>>, vector<1x256xf32>
    %4 = vector.broadcast %3 : vector<1x256xf32> to vector<8x256xf32>
    %5 = arith.addf %2, %4 : vector<8x256xf32>
    %cst_5 = arith.constant 0.000000e+00 : f32
    %6 = vector.broadcast %cst_5 : f32 to vector<8x256xf32>
    %7 = arith.maximumf %5, %6 : vector<8x256xf32>
    %8 = arith.truncf %7 : vector<8x256xf32> to vector<8x256xbf16>
    %c0_6 = arith.constant 0 : index
    %c0_7 = arith.constant 0 : index
    %9 = vector.load %arg4[%c0_6, %c0_7] : memref<256x64xbf16, #tpu.memory_space<vmem>>, vector<256x64xbf16>
    %cst_8 = arith.constant dense<0.000000e+00> : vector<8x64xf32>
    %10 = tpu.matmul %8, %9, %cst_8 {dimension_numbers = #tpu.dot_dimension_numbers<[1], [0], [0], [1], [0, 0, 1, 1], [], []>} : vector<8x256xbf16>, vector<256x64xbf16>, vector<8x64xf32> -> vector<8x64xf32>
    %c0_9 = arith.constant 0 : index
    %c0_10 = arith.constant 0 : index
    %11 = vector.load %arg5[%c0_9, %c0_10] : memref<1x64xf32, #tpu.memory_space<vmem>>, vector<1x64xf32>
    %12 = vector.broadcast %11 : vector<1x64xf32> to vector<8x64xf32>
    %13 = arith.addf %10, %12 : vector<8x64xf32>
    %c0_11 = arith.constant 0 : index
    %c0_12 = arith.constant 0 : index
    %14 = vector.load %arg6[%c0_11, %c0_12] : memref<8x64xf32, #tpu.memory_space<vmem>>, vector<8x64xf32>
    tpu.vector_store %arg6[%c0_11, %c0_12], %13 {strides = array<i32>} : memref<8x64xf32, #tpu.memory_space<vmem>>, vector<8x64xf32>,
    return
  }
  func.func @transform_0(%arg0: i32) -> (i32, i32) {
    %c0_i32 = arith.constant 0 : i32
    %c0_i32_0 = arith.constant 0 : i32
    return %arg0, %c0_i32 : i32, i32
  }
  func.func @transform_1(%arg0: i32) -> (i32, i32) {
    %c0_i32 = arith.constant 0 : i32
    %c0_i32_0 = arith.constant 0 : i32
    %c0_i32_1 = arith.constant 0 : i32
    return %c0_i32, %c0_i32_0 : i32, i32
  }
  func.func @transform_2(%arg0: i32) -> (i32, i32) {
    %c0_i32 = arith.constant 0 : i32
    %c0_i32_0 = arith.constant 0 : i32
    %c0_i32_1 = arith.constant 0 : i32
    return %c0_i32, %c0_i32_0 : i32, i32
  }
  func.func @transform_3(%arg0: i32) -> (i32, i32) {
    %c0_i32 = arith.constant 0 : i32
    %c0_i32_0 = arith.constant 0 : i32
    %c0_i32_1 = arith.constant 0 : i32
    return %c0_i32, %c0_i32_0 : i32, i32
  }
  func.func @transform_4(%arg0: i32) -> (i32, i32) {
    %c0_i32 = arith.constant 0 : i32
    %c0_i32_0 = arith.constant 0 : i32
    %c0_i32_1 = arith.constant 0 : i32
    return %c0_i32, %c0_i32_0 : i32, i32
  }
  func.func @transform_5(%arg0: i32) -> (i32, i32) {
    %c0_i32 = arith.constant 0 : i32
    %c0_i32_0 = arith.constant 0 : i32
    return %arg0, %c0_i32 : i32, i32
  }
}

</mosaic_0001>

<bundles_post_ra>
// kernel: encoder_forward.5
= control target key start
LH: loop header
LB: loop body
LE: loop exit
PB: predicated region body
PF: predicated region fallthrough
CT: control target
= control target key end

     0   :  { %v306_v2 = vmov 0   ;;  %vm120_vm0 = vcmask 1041408   ;;  %vm113_vm1 = vcmask 293888   ;;  %s427_s2 = inlined_call_operand.vmem [shape: bf16[36,512], index: 2, kind: input, shape index: {}]   ;;  %s428_s1 = inlined_call_operand.vmem [shape: f32[32,1], index: 1, kind: input, shape index: {}]   ;;  %s429_s0 = inlined_call_operand.vmem [shape: bf16[32,36], index: 0, kind: input, shape index: {}]   ;;  %s430_s3 = inlined_call_operand.vmem [shape: bf16[32,512], index: 3, kind: output, shape index: {}]  }
   0x1   :  { %v27_v0 = vld [vmem:[%s427_s2 + $0x40] sm:$0x33]  ;;  %v28_v1 = vld [vmem:[%s427_s2 + $0x48] sm:$0x33]  ;;  %304 = vset.pattern.permute.xlu0 %v306_v2  ;;  %305 = vset.pattern.permute.xlu1 %v306_v2  ;;  %v301_v8 = vld [vmem:[%s427_s2 + $0x2c] sm:$0xf0] }
   0x2   :  { %v89_v3 = vunpack.c.l.b16 %v27_v0  ;;  %v90_v4 = vunpack.c.h.b16 %v27_v0  ;;  %v91_v5 = vunpack.c.l.b16 %v28_v1  ;;  %v92_v6 = vunpack.c.h.b16 %v28_v1  ;;  %v271_v7 = vld [vmem:[%s427_s2 + $0x20] sm:$0xf]  ;;  %v299_v13 = vld [vmem:[%s427_s2 + $0x24] sm:$0xf]  ;;  %v273_v14 = vld [vmem:[%s427_s2 + $0x30] sm:$0xf0] }
   0x3   :  { %v279_v15 = vld [vmem:[%s427_s2 + $0x28] sm:$0xf]  ;;  %v302_v16 = vld [vmem:[%s427_s2 + $0x34] sm:$0xf0]  ;;  %v300_v17 = vld [vmem:[%s427_s2 + $0x2c] sm:$0xf]  ;;  %v272_v24 = vor.u32 %v301_v8, %v271_v7  ;;  %v276_v25 = vor.u32 %v299_v13, %v273_v14 }
   0x4   :  { %v101_v9 = vpack.c.b16 %v89_v3, %v89_v3  ;;  %v102_v10 = vpack.c.b16 %v90_v4, %v90_v4  ;;  %v103_v11 = vpack.c.b16 %v91_v5, %v91_v5  ;;  %v104_v12 = vpack.c.b16 %v92_v6, %v92_v6  ;;  %v281_v18 = vld [vmem:[%s427_s2 + $0x38] sm:$0xf0]  ;;  %v255_v23 = vld [vmem:[%s427_s2] sm:$0xf]  ;;  %v297_v26 = vld [vmem:[%s427_s2 + $0xc] sm:$0xf0] }
   0x5   :  { %v295_v27 = vld [vmem:[%s427_s2 + $0x4] sm:$0xf]  ;;  %v257_v28 = vld [vmem:[%s427_s2 + $0x10] sm:$0xf0]  ;;  %v280_v29 = vor.u32 %v302_v16, %v279_v15  ;;  %v284_v30 = vor.u32 %v300_v17, %v281_v18  ;;  %v263_v31 = vld [vmem:[%s427_s2 + $0x8] sm:$0xf]  ;;  %v256_v37 = vor.u32 %v297_v26, %v255_v23 }
   0x6   :  { %v122_v19 = vsel %vm120_vm0, %v101_v9, 0  ;;  %v125_v20 = vsel %vm120_vm0, %v102_v10, 0  ;;  %v128_v21 = vsel %vm120_vm0, %v103_v11, 0  ;;  %v131_v22 = vsel %vm120_vm0, %v104_v12, 0  ;;  %v298_v32 = vld [vmem:[%s427_s2 + $0x14] sm:$0xf0] }
   0x7   :  { %138 = vmatpush.bf16.msra.mxu0 %v122_v19  ;;  %157 = vmatpush.bf16.msra.mxu1 %v125_v20  ;;  %v29_v33 = vld [vmem:[%s428_s1] sm:$0xff]  ;;  %v296_v34 = vld [vmem:[%s427_s2 + $0xc] sm:$0xf]  ;;  %v265_v35 = vld [vmem:[%s427_s2 + $0x18] sm:$0xf0]  ;;  %v260_v38 = vor.u32 %v295_v27, %v257_v28  ;;  %v264_v39 = vor.u32 %v298_v32, %v263_v31 }
   0x8   :  { %176 = vmatpush.bf16.msra.mxu2 %v128_v21  ;;  %195 = vmatpush.bf16.msra.mxu3 %v131_v22  ;;  %v31_v36 = vld [vmem:[%s428_s1 + $0x10] sm:$0xff]  ;;  %v268_v40 = vor.u32 %v296_v34, %v265_v35  ;;  %v293_v41 = vld [vmem:[%s429_s0] sm:$0xff]  ;;  %v30_v42 = vld [vmem:[%s428_s1 + $0x8] sm:$0xff] }
   0x9   :  { %35 = vperm.xlu0 %304, %v29_v33   ;;  %45 = vperm.xlu1 %305, %v31_v36   ;;  %v32_v43 = vld [vmem:[%s428_s1 + $0x18] sm:$0xff]  ;;  %v294_v44 = vld [vmem:[%s429_s0 + $0x8] sm:$0xff] }
   0xb   :  { %139 = vmatpush.bf16.msra.mxu0 %v272_v24  ;;  %158 = vmatpush.bf16.msra.mxu1 %v276_v25 }
   0xc   :  { %177 = vmatpush.bf16.msra.mxu2 %v280_v29  ;;  %196 = vmatpush.bf16.msra.mxu3 %v284_v30 }
   0xf   :  { %140 = vmatpush.bf16.msra.mxu0 %v256_v37  ;;  %159 = vmatpush.bf16.msra.mxu1 %v260_v38 }
  0x10   :  { %178 = vmatpush.bf16.msra.mxu2 %v264_v39  ;;  %197 = vmatpush.bf16.msra.mxu3 %v268_v40 }
  0x11   :  { %40 = vperm.xlu0 %304, %v30_v42   ;;  %50 = vperm.xlu1 %305, %v32_v43  }
  0x12   :  { %285 = vmatmul.msk.bf16.vlgmr.msra.gmra.mxu0 %vm113_vm1, %v293_v41  ;;  %287 = vmatmul.msk.bf16.vlgmr.msra.gmra.mxu1 %vm113_vm1, %v293_v41 }
  0x13   :  { %289 = vmatmul.msk.bf16.vlgmr.msra.gmra.mxu2 %vm113_vm1, %v293_v41  ;;  %291 = vmatmul.msk.bf16.vlgmr.msra.gmra.mxu3 %vm113_vm1, %v293_v41 }
  0x22   :  { %286 = vmatmul.msk.bf16.gmra.mxu0 %vm113_vm1, %v294_v44  ;;  %288 = vmatmul.msk.bf16.gmra.mxu1 %vm113_vm1, %v294_v44 }
  0x23   :  { %290 = vmatmul.msk.bf16.gmra.mxu2 %vm113_vm1, %v294_v44  ;;  %292 = vmatmul.msk.bf16.gmra.mxu3 %vm113_vm1, %v294_v44 }
  0x7b   :  { %v36_v45 = vpop.permute.xlu0 %35  ;;  %v46_v3 = vpop.permute.xlu1 %45 }
  0x83   :  { %v41_v53 = vpop.permute.xlu0 %40  ;;  %v51_v19 = vpop.permute.xlu1 %50 }
  0x8f   :  { %v142_v46 = vpop.f32.mrf.mxu0  ;;  %v161_v47 = vpop.f32.mrf.mxu1 }
  0x90   :  { %v143_v48 = vadd.f32 %v142_v46, %v36_v45  ;;  %v162_v49 = vadd.f32 %v161_v47, %v36_v45 }
  0x92   :  { %v209_v50 = vmax.f32 %v143_v48, 0.0  ;;  %v210_v51 = vmax.f32 %v162_v49, 0.0 }
  0x94   :  { %v225_v52 = vpack.c.bf16 %v210_v51, %v209_v50 }
  0x96   :  { %233 = vst [vmem:[%s430_s3] sm:$0xff] %v225_v52  ;;  %v180_v54 = vpop.f32.mrf.mxu2  ;;  %v199_v55 = vpop.f32.mrf.mxu3 }
  0x97   :  { %v181_v56 = vadd.f32 %v180_v54, %v36_v45  ;;  %v200_v57 = vadd.f32 %v199_v55, %v36_v45  ;;  %v144_v58 = vpop.f32.mrf.mxu0  ;;  %v163_v59 = vpop.f32.mrf.mxu1 }
  0x98   :  { %v145_v60 = vadd.f32 %v144_v58, %v41_v53  ;;  %v164_v61 = vadd.f32 %v163_v59, %v41_v53 }
  0x99   :  { %v211_v62 = vmax.f32 %v181_v56, 0.0  ;;  %v212_v63 = vmax.f32 %v200_v57, 0.0 }
  0x9a   :  { %v213_v0 = vmax.f32 %v145_v60, 0.0  ;;  %v214_v1 = vmax.f32 %v164_v61, 0.0 }
  0x9b   :  { %v226_v2 = vpack.c.bf16 %v212_v63, %v211_v62 }
  0x9c   :  { %v227_v4 = vpack.c.bf16 %v214_v1, %v213_v0 }
  0x9d   :  { %234 = vst [vmem:[%s430_s3 + $0x8] sm:$0xff] %v226_v2 }
  0x9e   :  { %235 = vst [vmem:[%s430_s3 + $0x10] sm:$0xff] %v227_v4  ;;  %v182_v5 = vpop.f32.mrf.mxu2  ;;  %v201_v6 = vpop.f32.mrf.mxu3 }
  0x9f   :  { %v183_v7 = vadd.f32 %v182_v5, %v41_v53  ;;  %v202_v8 = vadd.f32 %v201_v6, %v41_v53  ;;  %v147_v9 = vpop.f32.mrf.mxu0  ;;  %v166_v10 = vpop.f32.mrf.mxu1 }
  0xa0   :  { %v148_v11 = vadd.f32 %v147_v9, %v46_v3  ;;  %v167_v12 = vadd.f32 %v166_v10, %v46_v3 }
  0xa1   :  { %v215_v13 = vmax.f32 %v183_v7, 0.0  ;;  %v216_v14 = vmax.f32 %v202_v8, 0.0 }
  0xa2   :  { %v217_v15 = vmax.f32 %v148_v11, 0.0  ;;  %v218_v16 = vmax.f32 %v167_v12, 0.0 }
  0xa3   :  { %v228_v17 = vpack.c.bf16 %v216_v14, %v215_v13 }
  0xa4   :  { %v229_v18 = vpack.c.bf16 %v218_v16, %v217_v15 }
  0xa5   :  { %236 = vst [vmem:[%s430_s3 + $0x18] sm:$0xff] %v228_v17 }
  0xa6   :  { %237 = vst [vmem:[%s430_s3 + $0x20] sm:$0xff] %v229_v18  ;;  %v185_v20 = vpop.f32.mrf.mxu2  ;;  %v204_v21 = vpop.f32.mrf.mxu3 }
  0xa7   :  { %v186_v22 = vadd.f32 %v185_v20, %v46_v3  ;;  %v205_v23 = vadd.f32 %v204_v21, %v46_v3  ;;  %v149_v24 = vpop.f32.mrf.mxu0  ;;  %v168_v25 = vpop.f32.mrf.mxu1 }
  0xa8   :  { %v150_v26 = vadd.f32 %v149_v24, %v51_v19  ;;  %v169_v27 = vadd.f32 %v168_v25, %v51_v19 }
  0xa9   :  { %v219_v28 = vmax.f32 %v186_v22, 0.0  ;;  %v220_v29 = vmax.f32 %v205_v23, 0.0 }
  0xaa   :  { %v221_v30 = vmax.f32 %v150_v26, 0.0  ;;  %v222_v31 = vmax.f32 %v169_v27, 0.0 }
  0xab   :  { %v230_v32 = vpack.c.bf16 %v220_v29, %v219_v28 }
  0xac   :  { %v231_v33 = vpack.c.bf16 %v222_v31, %v221_v30 }
  0xad   :  { %238 = vst [vmem:[%s430_s3 + $0x28] sm:$0xff] %v230_v32 }
  0xae   :  { %239 = vst [vmem:[%s430_s3 + $0x30] sm:$0xff] %v231_v33  ;;  %v187_v34 = vpop.f32.mrf.mxu2  ;;  %v206_v35 = vpop.f32.mrf.mxu3 }
  0xaf   :  { %v188_v36 = vadd.f32 %v187_v34, %v51_v19  ;;  %v207_v37 = vadd.f32 %v206_v35, %v51_v19 }
  0xb1   :  { %v223_v38 = vmax.f32 %v188_v36, 0.0  ;;  %v224_v39 = vmax.f32 %v207_v37, 0.0 }
  0xb3   :  { %v232_v40 = vpack.c.bf16 %v224_v39, %v223_v38 }
  0xb5   :  { %240 = vst [vmem:[%s430_s3 + $0x38] sm:$0xff] %v232_v40 }

// kernel: encoder_forward.6
= control target key start
LH: loop header
LB: loop body
LE: loop exit
PB: predicated region body
PF: predicated region fallthrough
CT: control target
= control target key end

     0   :  { %v445_v5 = vmov 0   ;;  %vm221_vm0 = vcmask 261120   ;;  %s576_s2 = inlined_call_operand.vmem [shape: bf16[288,128], index: 2, kind: input, shape index: {}]   ;;  %s577_s0 = inlined_call_operand.vmem [shape: bf16[32,288], index: 0, kind: input, shape index: {}]   ;;  %s578_s1 = inlined_call_operand.vmem [shape: f32[32,1], index: 1, kind: input, shape index: {}]   ;;  %s579_s3 = inlined_call_operand.vmem [shape: bf16[32,128], index: 3, kind: output, shape index: {}]  }
   0x1   :  { %v412_v0 = vld [vmem:[%s576_s2 + $0x38] sm:$0xff]  ;;  %v411_v2 = vld [vmem:[%s576_s2 + $0x30] sm:$0xff]  ;;  %v422_v3 = vld [vmem:[%s576_s2 + $0x88] sm:$0xff]  ;;  %443 = vset.pattern.permute.xlu0 %v445_v5  ;;  %444 = vset.pattern.permute.xlu1 %v445_v5 }
   0x2   :  { %v420_v1 = vld [vmem:[%s576_s2 + $0x78] sm:$0xff]  ;;  %228 = vmatpush.bf16.msra.mxu0 %v412_v0  ;;  %434 = vmatpush.bf16.msra.mxu3 %v412_v0  ;;  %v419_v4 = vld [vmem:[%s576_s2 + $0x70] sm:$0xff]  ;;  %v421_v6 = vld [vmem:[%s576_s2 + $0x80] sm:$0xff] }
   0x3   :  { %247 = vmatpush.bf16.msra.mxu1 %v420_v1  ;;  %272 = vmatpush.bf16.msra.mxu2 %v422_v3  ;;  %v311_v7 = vld [vmem:[%s577_s0 + $0x8] sm:$0xf]  ;;  %v401_v8 = vld [vmem:[%s577_s0 + $0x10] sm:$0xf0]  ;;  %v59_v12 = vld [vmem:[%s578_s1] sm:$0xff] }
   0x4   :  { %v410_v9 = vld [vmem:[%s576_s2 + $0x28] sm:$0xff]  ;;  %v312_v11 = vor.u32 %v401_v8, %v311_v7  ;;  %v409_v13 = vld [vmem:[%s576_s2 + $0x20] sm:$0xff]  ;;  %65 = vperm.xlu0 %443, %v59_v12   ;;  %v408_v15 = vld [vmem:[%s576_s2 + $0x18] sm:$0xff] }
   0x5   :  { %v418_v10 = vld [vmem:[%s576_s2 + $0x68] sm:$0xff]  ;;  %v417_v14 = vld [vmem:[%s576_s2 + $0x60] sm:$0xff]  ;;  %v416_v16 = vld [vmem:[%s576_s2 + $0x58] sm:$0xff] }
   0x6   :  { %229 = vmatpush.bf16.msra.mxu0 %v411_v2  ;;  %435 = vmatpush.bf16.msra.mxu3 %v411_v2  ;;  %v407_v17 = vld [vmem:[%s576_s2 + $0x10] sm:$0xff]  ;;  %v60_v19 = vld [vmem:[%s578_s1 + $0x8] sm:$0xff]  ;;  %v323_v21 = vld [vmem:[%s577_s0 + $0x20] sm:$0xf] }
   0x7   :  { %248 = vmatpush.bf16.msra.mxu1 %v419_v4  ;;  %273 = vmatpush.bf16.msra.mxu2 %v421_v6  ;;  %v61_v18 = vld [vmem:[%s578_s1 + $0x10] sm:$0xff]  ;;  %v404_v22 = vld [vmem:[%s577_s0 + $0x28] sm:$0xf0]  ;;  %v405_v26 = vld [vmem:[%s576_s2] sm:$0xff] }
   0x8   :  { %v415_v20 = vld [vmem:[%s576_s2 + $0x50] sm:$0xff]  ;;  %75 = vperm.xlu1 %444, %v61_v18   ;;  %v406_v23 = vld [vmem:[%s576_s2 + $0x8] sm:$0xff]  ;;  %v324_v25 = vor.u32 %v404_v22, %v323_v21  ;;  %v303_v27 = vld [vmem:[%s577_s0] sm:$0xf] }
   0x9   :  { %v414_v24 = vld [vmem:[%s576_s2 + $0x48] sm:$0xff]  ;;  %v62_v28 = vld [vmem:[%s578_s1 + $0x18] sm:$0xff]  ;;  %v403_v31 = vld [vmem:[%s577_s0 + $0x20] sm:$0xf0] }
   0xa   :  { %230 = vmatpush.bf16.msra.mxu0 %v410_v9  ;;  %436 = vmatpush.bf16.msra.mxu3 %v410_v9  ;;  %v400_v29 = vld [vmem:[%s577_s0 + $0x8] sm:$0xf0]  ;;  %v315_v30 = vld [vmem:[%s577_s0 + $0x18] sm:$0xf]  ;;  %v413_v32 = vld [vmem:[%s576_s2 + $0x40] sm:$0xff] }
   0xb   :  { %249 = vmatpush.bf16.msra.mxu1 %v418_v10  ;;  %397 = vmatmul.msk.bf16.vlgmr.msra.gmra.mxu2 %vm221_vm0, %v312_v11  ;;  %v399_v33 = vld [vmem:[%s577_s0 + $0x4] sm:$0xf]  ;;  %v305_v34 = vld [vmem:[%s577_s0 + $0xc] sm:$0xf0]  ;;  %v304_v35 = vor.u32 %v400_v29, %v303_v27  ;;  %v316_v36 = vor.u32 %v403_v31, %v315_v30  ;;  %v402_v38 = vld [vmem:[%s577_s0 + $0x1c] sm:$0xf] }
   0xc   :  { %70 = vperm.xlu0 %443, %v60_v19   ;;  %v308_v37 = vor.u32 %v399_v33, %v305_v34  ;;  %v317_v39 = vld [vmem:[%s577_s0 + $0x24] sm:$0xf0] }
   0xd   :  { %v320_v40 = vor.u32 %v402_v38, %v317_v39 }
   0xe   :  { %231 = vmatpush.bf16.msra.mxu0 %v409_v13  ;;  %437 = vmatpush.bf16.msra.mxu3 %v409_v13 }
   0xf   :  { %250 = vmatpush.bf16.msra.mxu1 %v417_v14 }
  0x10   :  { %80 = vperm.xlu1 %444, %v62_v28  }
  0x12   :  { %232 = vmatpush.bf16.msra.mxu0 %v408_v15  ;;  %438 = vmatpush.bf16.msra.mxu3 %v408_v15 }
  0x13   :  { %251 = vmatpush.bf16.msra.mxu1 %v416_v16 }
  0x16   :  { %233 = vmatpush.bf16.msra.mxu0 %v407_v17  ;;  %439 = vmatpush.bf16.msra.mxu3 %v407_v17 }
  0x17   :  { %252 = vmatpush.bf16.msra.mxu1 %v415_v20 }
  0x1a   :  { %234 = vmatpush.bf16.msra.mxu0 %v406_v23  ;;  %440 = vmatpush.bf16.msra.mxu3 %v406_v23 }
  0x1b   :  { %253 = vmatpush.bf16.msra.mxu1 %v414_v24  ;;  %398 = vmatmul.msk.bf16.gmra.mxu2 %vm221_vm0, %v324_v25 }
  0x1e   :  { %235 = vmatpush.bf16.msra.mxu0 %v405_v26  ;;  %441 = vmatpush.bf16.msra.mxu3 %v405_v26 }
  0x1f   :  { %254 = vmatpush.bf16.msra.mxu1 %v413_v32 }
  0x21   :  { %236 = vmatmul.bf16.vlgmr.msra.gmra.mxu0 %v304_v35  ;;  %241 = vmatmul.bf16.vlgmr.msra.gmra.mxu3 %v316_v36 }
  0x22   :  { %255 = vmatmul.bf16.vlgmr.msra.gmra.mxu1 %v308_v37 }
  0x32   :  { %260 = vmatmul.bf16.gmra.mxu1 %v320_v40 }
  0x76   :  { %v66_v41 = vpop.permute.xlu0 %65 }
  0x7a   :  { %v76_v53 = vpop.permute.xlu1 %75 }
  0x7e   :  { %v71_v46 = vpop.permute.xlu0 %70 }
  0x82   :  { %v81_v63 = vpop.permute.xlu1 %80 }
  0x8e   :  { %v275_v42 = vpop.f32.mrf.mxu2 }
  0x96   :  { %v277_v48 = vpop.f32.mrf.mxu2 }
  0x9e   :  { %v237_v43 = vpop.f32.mrf.mxu0  ;;  %v280_v60 = vpop.f32.mrf.mxu2 }
  0x9f   :  { %v256_v44 = vpop.f32.mrf.mxu1  ;;  %v238_v45 = vadd.f32 %v237_v43, %v66_v41 }
  0xa1   :  { %v257_v47 = vadd.f32 %v256_v44, %v238_v45 }
  0xa3   :  { %v276_v52 = vadd.f32 %v275_v42, %v257_v47 }
  0xa4   :  { %v242_v54 = vpop.f32.mrf.mxu3 }
  0xa5   :  { %v285_v57 = vmax.f32 %v276_v52, 0.0  ;;  %v243_v62 = vadd.f32 %v242_v54, %v76_v53 }
  0xa6   :  { %v239_v49 = vpop.f32.mrf.mxu0  ;;  %v282_v6 = vpop.f32.mrf.mxu2 }
  0xa7   :  { %v240_v50 = vadd.f32 %v239_v49, %v71_v46  ;;  %v258_v51 = vpop.f32.mrf.mxu1 }
  0xa9   :  { %v259_v55 = vadd.f32 %v258_v51, %v240_v50 }
  0xab   :  { %v278_v56 = vadd.f32 %v277_v48, %v259_v55 }
  0xac   :  { %v244_v0 = vpop.f32.mrf.mxu3 }
  0xad   :  { %v286_v58 = vmax.f32 %v278_v56, 0.0  ;;  %v245_v2 = vadd.f32 %v244_v0, %v81_v63 }
  0xaf   :  { %v426_v59 = vpack.c.bf16 %v286_v58, %v285_v57  ;;  %v261_v61 = vpop.f32.mrf.mxu1 }
  0xb0   :  { %v262_v1 = vadd.f32 %v261_v61, %v243_v62 }
  0xb1   :  { %427 = vst [vmem:[%s579_s3] sm:$0xff] %v426_v59  }
  0xb2   :  { %v281_v4 = vadd.f32 %v280_v60, %v262_v1 }
  0xb4   :  { %v287_v8 = vmax.f32 %v281_v4, 0.0 }
  0xb7   :  { %v263_v3 = vpop.f32.mrf.mxu1 }
  0xb8   :  { %v264_v5 = vadd.f32 %v263_v3, %v245_v2 }
  0xba   :  { %v283_v7 = vadd.f32 %v282_v6, %v264_v5 }
  0xbc   :  { %v288_v9 = vmax.f32 %v283_v7, 0.0 }
  0xbe   :  { %v431_v10 = vpack.c.bf16 %v288_v9, %v287_v8 }
  0xc0   :  { %433 = vst [vmem:[%s579_s3 + $0x8] sm:$0xff] %v431_v10  }

// kernel: encoder_forward.7
= control target key start
LH: loop header
LB: loop body
LE: loop exit
PB: predicated region body
PF: predicated region fallthrough
CT: control target
= control target key end

     0   :  { %vm283_vm0 = vcmask 261120   ;;  %v608_v15 = vmov 0   ;;  %s815_s2 = inlined_call_operand.vmem [shape: bf16[288,128], index: 2, kind: input, shape index: {}]   ;;  %s816_s0 = inlined_call_operand.vmem [shape: bf16[64,288], index: 0, kind: input, shape index: {}]   ;;  %s817_s1 = inlined_call_operand.vmem [shape: f32[64,1], index: 1, kind: input, shape index: {}]   ;;  %s818_s3 = inlined_call_operand.vmem [shape: bf16[64,128], index: 3, kind: output, shape index: {}]  }
   0x1   :  { %v554_v0 = vld [vmem:[%s815_s2 + $0x38] sm:$0xff]  ;;  %v564_v2 = vld [vmem:[%s815_s2 + $0x88] sm:$0xff]  ;;  %v553_v3 = vld [vmem:[%s815_s2 + $0x30] sm:$0xff]  ;;  %606 = vset.pattern.permute.xlu1 %v608_v15  ;;  %605 = vset.pattern.permute.xlu0 %v608_v15 }
   0x2   :  { %v635_v1 = vld [vmem:[%s815_s2 + $0x78] sm:$0xff]  ;;  %296 = vmatpush.bf16.msra.mxu0 %v554_v0  ;;  %588 = vmatpush.bf16.msra.mxu3 %v554_v0  ;;  %v647_v4 = vld [vmem:[%s815_s2 + $0x70] sm:$0xff]  ;;  %v563_v5 = vld [vmem:[%s815_s2 + $0x80] sm:$0xff] }
   0x3   :  { %596 = vmatpush.bf16.msra.mxu1 %v635_v1  ;;  %360 = vmatpush.bf16.msra.mxu2 %v564_v2  ;;  %v421_v6 = vld [vmem:[%s816_s0 + $0x8] sm:$0xf]  ;;  %v537_v7 = vld [vmem:[%s816_s0 + $0x10] sm:$0xf0]  ;;  %v551_v11 = vld [vmem:[%s815_s2 + $0x20] sm:$0xff] }
   0x4   :  { %v552_v8 = vld [vmem:[%s815_s2 + $0x28] sm:$0xff]  ;;  %v422_v10 = vor.u32 %v537_v7, %v421_v6  ;;  %v675_v12 = vld [vmem:[%s815_s2 + $0x60] sm:$0xff]  ;;  %v550_v13 = vld [vmem:[%s815_s2 + $0x18] sm:$0xff]  ;;  %607 = vset.pattern.permute.xlu2 %v608_v15 }
   0x5   :  { %v665_v9 = vld [vmem:[%s815_s2 + $0x68] sm:$0xff]  ;;  %v684_v14 = vld [vmem:[%s815_s2 + $0x58] sm:$0xff]  ;;  %v549_v16 = vld [vmem:[%s815_s2 + $0x10] sm:$0xff] }
   0x6   :  { %297 = vmatpush.bf16.msra.mxu0 %v553_v3  ;;  %589 = vmatpush.bf16.msra.mxu3 %v553_v3  ;;  %v69_v17 = vld [vmem:[%s817_s1 + $0x10] sm:$0xff]  ;;  %v433_v19 = vld [vmem:[%s816_s0 + $0x20] sm:$0xf]  ;;  %v540_v20 = vld [vmem:[%s816_s0 + $0x28] sm:$0xf0] }
   0x7   :  { %597 = vmatpush.bf16.msra.mxu1 %v647_v4  ;;  %361 = vmatpush.bf16.msra.mxu2 %v563_v5  ;;  %v557_v18 = vld [vmem:[%s815_s2 + $0x50] sm:$0xff]  ;;  %v548_v21 = vld [vmem:[%s815_s2 + $0x8] sm:$0xff]  ;;  %v434_v23 = vor.u32 %v540_v20, %v433_v19  ;;  %v67_v24 = vld [vmem:[%s817_s1] sm:$0xff] }
   0x8   :  { %87 = vperm.xlu1 %606, %v69_v17   ;;  %v556_v22 = vld [vmem:[%s815_s2 + $0x48] sm:$0xff]  ;;  %77 = vperm.xlu0 %605, %v67_v24   ;;  %v547_v25 = vld [vmem:[%s815_s2] sm:$0xff]  ;;  %v425_v26 = vld [vmem:[%s816_s0 + $0x18] sm:$0xf] }
   0x9   :  { %v70_v27 = vld [vmem:[%s817_s1 + $0x18] sm:$0xff]  ;;  %v539_v28 = vld [vmem:[%s816_s0 + $0x20] sm:$0xf0]  ;;  %v413_v29 = vld [vmem:[%s816_s0] sm:$0xf] }
   0xa   :  { %298 = vmatpush.bf16.msra.mxu0 %v552_v8  ;;  %590 = vmatpush.bf16.msra.mxu3 %v552_v8  ;;  %v536_v30 = vld [vmem:[%s816_s0 + $0x8] sm:$0xf0]  ;;  %v555_v31 = vld [vmem:[%s815_s2 + $0x40] sm:$0xff]  ;;  %v538_v32 = vld [vmem:[%s816_s0 + $0x1c] sm:$0xf]  ;;  %v426_v34 = vor.u32 %v539_v28, %v425_v26 }
   0xb   :  { %598 = vmatpush.bf16.msra.mxu1 %v665_v9  ;;  %531 = vmatmul.msk.bf16.vlgmr.msra.gmra.mxu2 %vm283_vm0, %v422_v10  ;;  %v427_v33 = vld [vmem:[%s816_s0 + $0x24] sm:$0xf0]  ;;  %v414_v35 = vor.u32 %v536_v30, %v413_v29  ;;  %v74_v38 = vld [vmem:[%s817_s1 + $0x38] sm:$0xff]  ;;  %v71_v39 = vld [vmem:[%s817_s1 + $0x20] sm:$0xff] }
   0xc   :  { %v430_v36 = vor.u32 %v538_v32, %v427_v33  ;;  %v68_v37 = vld [vmem:[%s817_s1 + $0x8] sm:$0xff]  ;;  %v445_v40 = vld [vmem:[%s816_s0 + $0x38] sm:$0xf]  ;;  %v543_v41 = vld [vmem:[%s816_s0 + $0x40] sm:$0xf0]  ;;  %97 = vperm.xlu2 %607, %v71_v39  }
   0xd   :  { %v446_v42 = vor.u32 %v543_v41, %v445_v40  ;;  %v73_v43 = vld [vmem:[%s817_s1 + $0x30] sm:$0xff]  ;;  %v72_v44 = vld [vmem:[%s817_s1 + $0x28] sm:$0xff]  ;;  %v542_v46 = vld [vmem:[%s816_s0 + $0x38] sm:$0xf0] }
   0xe   :  { %299 = vmatpush.bf16.msra.mxu0 %v551_v11  ;;  %591 = vmatpush.bf16.msra.mxu3 %v551_v11  ;;  %v437_v45 = vld [vmem:[%s816_s0 + $0x30] sm:$0xf]  ;;  %v541_v47 = vld [vmem:[%s816_s0 + $0x34] sm:$0xf]  ;;  %v439_v48 = vld [vmem:[%s816_s0 + $0x3c] sm:$0xf0] }
   0xf   :  { %599 = vmatpush.bf16.msra.mxu1 %v675_v12  ;;  %v438_v49 = vor.u32 %v542_v46, %v437_v45  ;;  %v442_v50 = vor.u32 %v541_v47, %v439_v48  ;;  %v457_v51 = vld [vmem:[%s816_s0 + $0x50] sm:$0xf]  ;;  %v546_v52 = vld [vmem:[%s816_s0 + $0x58] sm:$0xf0]  ;;  %v535_v54 = vld [vmem:[%s816_s0 + $0x4] sm:$0xf] }
  0x10   :  { %92 = vperm.xlu1 %606, %v70_v27   ;;  %82 = vperm.xlu0 %605, %v68_v37   ;;  %v458_v53 = vor.u32 %v546_v52, %v457_v51  ;;  %v415_v55 = vld [vmem:[%s816_s0 + $0xc] sm:$0xf0]  ;;  %v449_v57 = vld [vmem:[%s816_s0 + $0x48] sm:$0xf]  ;;  %v545_v58 = vld [vmem:[%s816_s0 + $0x50] sm:$0xf0] }
  0x11   :  { %v418_v56 = vor.u32 %v535_v54, %v415_v55  ;;  %v544_v59 = vld [vmem:[%s816_s0 + $0x4c] sm:$0xf]  ;;  %v451_v60 = vld [vmem:[%s816_s0 + $0x54] sm:$0xf0]  ;;  %v450_v61 = vor.u32 %v545_v58, %v449_v57 }
  0x12   :  { %300 = vmatpush.bf16.msra.mxu0 %v550_v13  ;;  %592 = vmatpush.bf16.msra.mxu3 %v550_v13  ;;  %v454_v62 = vor.u32 %v544_v59, %v451_v60 }
  0x13   :  { %600 = vmatpush.bf16.msra.mxu1 %v684_v14 }
  0x14   :  { %102 = vperm.xlu2 %607, %v72_v44  }
  0x16   :  { %301 = vmatpush.bf16.msra.mxu0 %v549_v16  ;;  %593 = vmatpush.bf16.msra.mxu3 %v549_v16 }
  0x17   :  { %601 = vmatpush.bf16.msra.mxu1 %v557_v18 }
  0x18   :  { %112 = vperm.xlu1 %606, %v74_v38   ;;  %107 = vperm.xlu0 %605, %v73_v43  }
  0x1a   :  { %302 = vmatpush.bf16.msra.mxu0 %v548_v21  ;;  %594 = vmatpush.bf16.msra.mxu3 %v548_v21 }
  0x1b   :  { %602 = vmatpush.bf16.msra.mxu1 %v556_v22  ;;  %532 = vmatmul.msk.bf16.gmra.mxu2 %vm283_vm0, %v434_v23 }
  0x1e   :  { %303 = vmatpush.bf16.msra.mxu0 %v547_v25  ;;  %595 = vmatpush.bf16.msra.mxu3 %v547_v25 }
  0x1f   :  { %603 = vmatpush.bf16.msra.mxu1 %v555_v31 }
  0x21   :  { %309 = vmatmul.bf16.vlgmr.msra.gmra.mxu3 %v426_v34  ;;  %304 = vmatmul.bf16.vlgmr.msra.gmra.mxu0 %v414_v35 }
  0x22   :  { %325 = vmatpush.bf16.msrb.mxu0 %v635_v1  ;;  %338 = vmatmul.bf16.vlgmr.msra.gmra.mxu1 %v430_v36 }
  0x26   :  { %326 = vmatpush.bf16.msrb.mxu0 %v647_v4 }
  0x2a   :  { %327 = vmatpush.bf16.msrb.mxu0 %v665_v9 }
  0x2b   :  { %533 = vmatmul.msk.bf16.gmra.mxu2 %vm283_vm0, %v446_v42 }
  0x2e   :  { %328 = vmatpush.bf16.msrb.mxu0 %v675_v12 }
  0x31   :  { %314 = vmatmul.bf16.gmra.mxu3 %v438_v49 }
  0x32   :  { %329 = vmatpush.bf16.msrb.mxu0 %v684_v14  ;;  %343 = vmatmul.bf16.gmra.mxu1 %v442_v50 }
  0x36   :  { %330 = vmatpush.bf16.msrb.mxu0 %v557_v18 }
  0x3a   :  { %331 = vmatpush.bf16.msrb.mxu0 %v556_v22 }
  0x3b   :  { %534 = vmatmul.msk.bf16.gmra.mxu2 %vm283_vm0, %v458_v53 }
  0x3e   :  { %332 = vmatpush.bf16.msrb.mxu0 %v555_v31 }
  0x41   :  { %333 = vmatmul.bf16.vlgmr.msrb.gmra.mxu0 %v418_v56  ;;  %319 = vmatmul.bf16.gmra.mxu3 %v450_v61 }
  0x42   :  { %348 = vmatmul.bf16.gmra.mxu1 %v454_v62 }
  0x66   :  { %v98_v16 = vpop.permute.xlu2 %97 }
  0x6e   :  { %v103_v27 = vpop.permute.xlu2 %102 }
  0x7a   :  { %v88_v3 = vpop.permute.xlu1 %87  ;;  %v78_v17 = vpop.permute.xlu0 %77 }
  0x82   :  { %v93_v9 = vpop.permute.xlu1 %92  ;;  %v83_v28 = vpop.permute.xlu0 %82 }
  0x8a   :  { %v108_v48 = vpop.permute.xlu0 %107  ;;  %v113_v56 = vpop.permute.xlu1 %112 }
  0x8e   :  { %v363_v63 = vpop.f32.mrf.mxu2 }
  0x96   :  { %v365_v0 = vpop.f32.mrf.mxu2 }
  0x9e   :  { %v368_v1 = vpop.f32.mrf.mxu2  ;;  %v305_v7 = vpop.f32.mrf.mxu0 }
  0x9f   :  { %v339_v2 = vpop.f32.mrf.mxu1  ;;  %v306_v34 = vadd.f32 %v305_v7, %v78_v17 }
  0xa4   :  { %v310_v4 = vpop.f32.mrf.mxu3 }
  0xa5   :  { %v311_v5 = vadd.f32 %v310_v4, %v88_v3 }
  0xa6   :  { %v370_v8 = vpop.f32.mrf.mxu2  ;;  %v307_v19 = vpop.f32.mrf.mxu0 }
  0xa7   :  { %v341_v6 = vpop.f32.mrf.mxu1  ;;  %v340_v10 = vadd.f32 %v339_v2, %v311_v5  ;;  %v308_v39 = vadd.f32 %v307_v19, %v83_v28 }
  0xa9   :  { %v369_v13 = vadd.f32 %v368_v1, %v340_v10 }
  0xab   :  { %v385_v21 = vmax.f32 %v369_v13, 0.0 }
  0xac   :  { %v312_v11 = vpop.f32.mrf.mxu3 }
  0xad   :  { %v313_v12 = vadd.f32 %v312_v11, %v93_v9 }
  0xae   :  { %v373_v20 = vpop.f32.mrf.mxu2 }
  0xaf   :  { %v342_v14 = vadd.f32 %v341_v6, %v313_v12  ;;  %v344_v15 = vpop.f32.mrf.mxu1 }
  0xb1   :  { %v371_v18 = vadd.f32 %v370_v8, %v342_v14 }
  0xb3   :  { %v386_v22 = vmax.f32 %v371_v18, 0.0 }
  0xb4   :  { %v315_v23 = vpop.f32.mrf.mxu3 }
  0xb5   :  { %v573_v24 = vpack.c.bf16 %v386_v22, %v385_v21  ;;  %v316_v25 = vadd.f32 %v315_v23, %v98_v16 }
  0xb6   :  { %v375_v31 = vpop.f32.mrf.mxu2 }
  0xb7   :  { %585 = vst [vmem:[%s818_s3 + $0x8] sm:$0xff] %v573_v24   ;;  %v346_v26 = vpop.f32.mrf.mxu1  ;;  %v345_v29 = vadd.f32 %v344_v15, %v316_v25 }
  0xb9   :  { %v374_v35 = vadd.f32 %v373_v20, %v345_v29 }
  0xbb   :  { %v387_v40 = vmax.f32 %v374_v35, 0.0 }
  0xbc   :  { %v317_v32 = vpop.f32.mrf.mxu3 }
  0xbd   :  { %v318_v33 = vadd.f32 %v317_v32, %v103_v27 }
  0xbe   :  { %v334_v30 = vpop.f32.mrf.mxu0  ;;  %v378_v49 = vpop.f32.mrf.mxu2 }
  0xbf   :  { %v347_v36 = vadd.f32 %v346_v26, %v318_v33  ;;  %v335_v37 = vadd.f32 %v334_v30, %v306_v34  ;;  %v349_v44 = vpop.f32.mrf.mxu1 }
  0xc1   :  { %v376_v38 = vadd.f32 %v375_v31, %v347_v36  ;;  %v364_v43 = vadd.f32 %v363_v63, %v335_v37 }
  0xc3   :  { %v388_v41 = vmax.f32 %v376_v38, 0.0  ;;  %v383_v52 = vmax.f32 %v364_v43, 0.0 }
  0xc4   :  { %v320_v46 = vpop.f32.mrf.mxu3 }
  0xc5   :  { %v578_v47 = vpack.c.bf16 %v388_v41, %v387_v40  ;;  %v321_v51 = vadd.f32 %v320_v46, %v108_v48 }
  0xc6   :  { %v336_v42 = vpop.f32.mrf.mxu0  ;;  %v380_v62 = vpop.f32.mrf.mxu2 }
  0xc7   :  { %v337_v45 = vadd.f32 %v336_v42, %v308_v39  ;;  %586 = vst [vmem:[%s818_s3 + $0x10] sm:$0xff] %v578_v47   ;;  %v350_v55 = vadd.f32 %v349_v44, %v321_v51  ;;  %v351_v59 = vpop.f32.mrf.mxu1 }
  0xc9   :  { %v366_v50 = vadd.f32 %v365_v0, %v337_v45  ;;  %v379_v60 = vadd.f32 %v378_v49, %v350_v55 }
  0xcb   :  { %v384_v53 = vmax.f32 %v366_v50, 0.0  ;;  %v389_v0 = vmax.f32 %v379_v60, 0.0 }
  0xcc   :  { %v322_v57 = vpop.f32.mrf.mxu3 }
  0xcd   :  { %v568_v54 = vpack.c.bf16 %v384_v53, %v383_v52  ;;  %v323_v58 = vadd.f32 %v322_v57, %v113_v56 }
  0xcf   :  { %569 = vst [vmem:[%s818_s3] sm:$0xff] %v568_v54   ;;  %v352_v61 = vadd.f32 %v351_v59, %v323_v58 }
  0xd1   :  { %v381_v63 = vadd.f32 %v380_v62, %v352_v61 }
  0xd3   :  { %v390_v1 = vmax.f32 %v381_v63, 0.0 }
  0xd5   :  { %v583_v2 = vpack.c.bf16 %v390_v1, %v389_v0 }
  0xd7   :  { %587 = vst [vmem:[%s818_s3 + $0x18] sm:$0xff] %v583_v2  }

// kernel: encoder_forward.9
= control target key start
LH: loop header
LB: loop body
LE: loop exit
PB: predicated region body
PF: predicated region fallthrough
CT: control target
= control target key end

     0   :  { %vm76_vm0 = vcmask 523264   ;;  %s537_s1 = inlined_call_operand.vmem [shape: bf16[64,256], index: 1, kind: input, shape index: {}]   ;;  %s538_s3 = inlined_call_operand.vmem [shape: bf16[256,64], index: 3, kind: input, shape index: {}]   ;;  %s539_s0 = inlined_call_operand.vmem [shape: bf16[8,64], index: 0, kind: input, shape index: {}]   ;;  %s540_s4 = inlined_call_operand.vmem [shape: f32[1,64], index: 4, kind: input, shape index: {}]   ;;  %s541_s2 = inlined_call_operand.vmem [shape: f32[1,256], index: 2, kind: input, shape index: {}]   ;;  %s542_s5 = inlined_call_operand.vmem [shape: f32[8,64], index: 5, kind: output, shape index: {}]  }
   0x1   :  { %v299_v0 = vld [vmem:[%s537_s1 + $0x30] sm:$0xf]  ;;  %v378_v1 = vld [vmem:[%s537_s1 + $0x34] sm:$0xf0]  ;;  %v377_v2 = vld [vmem:[%s537_s1 + $0x34] sm:$0xf] }
   0x2   :  { %v300_v3 = vor.u32 %v378_v1, %v299_v0  ;;  %v301_v4 = vld [vmem:[%s537_s1 + $0x38] sm:$0xf0]  ;;  %v291_v5 = vld [vmem:[%s537_s1 + $0x20] sm:$0xf]  ;;  %v376_v6 = vld [vmem:[%s537_s1 + $0x24] sm:$0xf0] }
   0x3   :  { %v304_v7 = vor.u32 %v377_v2, %v301_v4  ;;  %v375_v8 = vld [vmem:[%s537_s1 + $0x24] sm:$0xf]  ;;  %v293_v9 = vld [vmem:[%s537_s1 + $0x28] sm:$0xf0]  ;;  %v292_v10 = vor.u32 %v376_v6, %v291_v5  ;;  %v283_v12 = vld [vmem:[%s537_s1 + $0x10] sm:$0xf] }
   0x4   :  { %84 = vmatpush.bf16.msra.mxu0 %v300_v3  ;;  %v296_v11 = vor.u32 %v375_v8, %v293_v9  ;;  %v374_v13 = vld [vmem:[%s537_s1 + $0x14] sm:$0xf0]  ;;  %v373_v14 = vld [vmem:[%s537_s1 + $0x14] sm:$0xf]  ;;  %v285_v15 = vld [vmem:[%s537_s1 + $0x18] sm:$0xf0] }
   0x5   :  { %97 = vmatpush.bf16.msra.mxu1 %v304_v7  ;;  %v386_v16 = vld [vmem:[%s538_s3 + $0x38] sm:$0xff]  ;;  %v284_v18 = vor.u32 %v374_v13, %v283_v12  ;;  %v385_v19 = vld [vmem:[%s538_s3 + $0x30] sm:$0xff]  ;;  %v288_v20 = vor.u32 %v373_v14, %v285_v15  ;;  %v275_v21 = vld [vmem:[%s537_s1] sm:$0xf] }
   0x6   :  { %v394_v17 = vld [vmem:[%s538_s3 + $0x78] sm:$0xff]  ;;  %242 = vmatpush.bf16.msra.mxu2 %v386_v16  ;;  %v372_v22 = vld [vmem:[%s537_s1 + $0x4] sm:$0xf0]  ;;  %v393_v23 = vld [vmem:[%s538_s3 + $0x70] sm:$0xff] }
   0x7   :  { %255 = vmatpush.bf16.msra.mxu3 %v394_v17  ;;  %v371_v24 = vld [vmem:[%s537_s1 + $0x4] sm:$0xf]  ;;  %v277_v25 = vld [vmem:[%s537_s1 + $0x8] sm:$0xf0]  ;;  %v276_v26 = vor.u32 %v372_v22, %v275_v21  ;;  %v21_v30 = vld [vmem:[%s539_s0] sm:$0xf] }
   0x8   :  { %85 = vmatpush.bf16.msra.mxu0 %v292_v10  ;;  %v384_v27 = vld [vmem:[%s538_s3 + $0x28] sm:$0xff]  ;;  %v280_v28 = vor.u32 %v371_v24, %v277_v25  ;;  %v383_v31 = vld [vmem:[%s538_s3 + $0x20] sm:$0xff]  ;;  %v382_v33 = vld [vmem:[%s538_s3 + $0x18] sm:$0xff] }
   0x9   :  { %98 = vmatpush.bf16.msra.mxu1 %v296_v11  ;;  %v392_v29 = vld [vmem:[%s538_s3 + $0x68] sm:$0xff]  ;;  %v391_v32 = vld [vmem:[%s538_s3 + $0x60] sm:$0xff]  ;;  %v390_v34 = vld [vmem:[%s538_s3 + $0x58] sm:$0xff] }
   0xa   :  { %243 = vmatpush.bf16.msra.mxu2 %v385_v19  ;;  %v381_v35 = vld [vmem:[%s538_s3 + $0x10] sm:$0xff]  ;;  %v380_v37 = vld [vmem:[%s538_s3 + $0x8] sm:$0xff]  ;;  %v379_v39 = vld [vmem:[%s538_s3] sm:$0xff] }
   0xb   :  { %256 = vmatpush.bf16.msra.mxu3 %v393_v23  ;;  %v389_v36 = vld [vmem:[%s538_s3 + $0x50] sm:$0xff]  ;;  %v388_v38 = vld [vmem:[%s538_s3 + $0x48] sm:$0xff]  ;;  %v387_v40 = vld [vmem:[%s538_s3 + $0x40] sm:$0xff] }
   0xc   :  { %86 = vmatpush.bf16.msra.mxu0 %v284_v18  ;;  %v30_v41 = vld [vmem:[%s541_s2] sm:$0x3] }
   0xd   :  { %99 = vmatpush.bf16.msra.mxu1 %v288_v20  ;;  %v32_v42 = vperm.slane %v30_v41, 0  ;;  %v33_v43 = vperm.slane %v30_v41, 1  ;;  %v395_v54 = vld [vmem:[%s540_s4] ss:$0 sm:$0xff] }
   0xe   :  { %244 = vmatpush.bf16.msra.mxu2 %v384_v27 }
   0xf   :  { %257 = vmatpush.bf16.msra.mxu3 %v392_v29 }
  0x10   :  { %87 = vmatpush.bf16.msra.mxu0 %v276_v26 }
  0x11   :  { %100 = vmatpush.bf16.msra.mxu1 %v280_v28 }
  0x12   :  { %245 = vmatpush.bf16.msra.mxu2 %v383_v31 }
  0x13   :  { %305 = vmatmul.msk.bf16.vlgmr.msra.gmra.mxu0 %vm76_vm0, %v21_v30  ;;  %258 = vmatpush.bf16.msra.mxu3 %v391_v32 }
  0x14   :  { %306 = vmatmul.msk.bf16.vlgmr.msra.gmra.mxu1 %vm76_vm0, %v21_v30 }
  0x16   :  { %246 = vmatpush.bf16.msra.mxu2 %v382_v33 }
  0x17   :  { %259 = vmatpush.bf16.msra.mxu3 %v390_v34 }
  0x1a   :  { %247 = vmatpush.bf16.msra.mxu2 %v381_v35 }
  0x1b   :  { %260 = vmatpush.bf16.msra.mxu3 %v389_v36 }
  0x1e   :  { %248 = vmatpush.bf16.msra.mxu2 %v380_v37 }
  0x1f   :  { %261 = vmatpush.bf16.msra.mxu3 %v388_v38 }
  0x22   :  { %249 = vmatpush.bf16.msra.mxu2 %v379_v39 }
  0x23   :  { %262 = vmatpush.bf16.msra.mxu3 %v387_v40 }
  0x90   :  { %v89_v44 = vpop.f32.mrf.mxu0 }
  0x91   :  { %v90_v45 = vadd.f32 %v89_v44, %v32_v42  ;;  %v102_v46 = vpop.f32.mrf.mxu1 }
  0x92   :  { %v103_v47 = vadd.f32 %v102_v46, %v33_v43 }
  0x93   :  { %v106_v48 = vmax.f32 %v90_v45, 0.0 }
  0x94   :  { %v107_v49 = vmax.f32 %v103_v47, 0.0 }
  0x95   :  { %v108_v50 = vpack.c.bf16 %v106_v48, %v106_v48 }
  0x96   :  { %v109_v51 = vpack.c.bf16 %v107_v49, %v107_v49 }
  0x97   :  { %250 = vmatmul.bf16.vlgmr.msra.gmra.mxu2 %v108_v50 }
  0x98   :  { %263 = vmatmul.bf16.vlgmr.msra.gmra.mxu3 %v109_v51  ;;  %v91_v52 = vpop.f32.mrf.mxu0 }
  0x99   :  { %v104_v53 = vpop.f32.mrf.mxu1 }
 0x11a   :  { %v251_v55 = vpop.f32.mrf.mxu2 }
 0x11b   :  { %v252_v56 = vadd.f32 %v395_v54, %v251_v55  ;;  %v264_v57 = vpop.f32.mrf.mxu3 }
 0x11d   :  { %v265_v58 = vadd.f32 %v264_v57, %v252_v56 }
 0x11f   :  { %268 = vst.msk [vmem:[%s542_s5] sm:$0xff] %vm76_vm0, %v265_v58 }
 0x122   :  { %v253_v59 = vpop.f32.mrf.mxu2 }
 0x123   :  { %v266_v60 = vpop.f32.mrf.mxu3 }

// kernel: encoder_forward.8
= control target key start
LH: loop header
LB: loop body
LE: loop exit
PB: predicated region body
PF: predicated region fallthrough
CT: control target
= control target key end

     0   :  { %v988_v6 = vmov 0   ;;  %vm475_vm0 = vcmask 523264   ;;  %s1283_s2 = inlined_call_operand.vmem [shape: bf16[576,128], index: 2, kind: input, shape index: {}]   ;;  %s1284_s1 = inlined_call_operand.vmem [shape: f32[64,1], index: 1, kind: input, shape index: {}]   ;;  %s1285_s0 = inlined_call_operand.vmem [shape: bf16[64,576], index: 0, kind: input, shape index: {}]   ;;  %s1286_s3 = inlined_call_operand.vmem [shape: bf16[64,128], index: 3, kind: output, shape index: {}]  }
   0x1   :  { %v916_v0 = vld [vmem:[%s1283_s2 + $0x38] sm:$0xff]  ;;  %v915_v1 = vld [vmem:[%s1283_s2 + $0x30] sm:$0xff]  ;;  %v914_v4 = vld [vmem:[%s1283_s2 + $0x28] sm:$0xff]  ;;  %986 = vset.pattern.permute.xlu1 %v988_v6  ;;  %985 = vset.pattern.permute.xlu0 %v988_v6 }
   0x2   :  { %968 = vmatpush.bf16.msra.mxu1 %v916_v0  ;;  %969 = vmatpush.bf16.msra.mxu2 %v916_v0  ;;  %v940_v2 = vld [vmem:[%s1283_s2 + $0xf8] sm:$0xff]  ;;  %v939_v3 = vld [vmem:[%s1283_s2 + $0xf0] sm:$0xff]  ;;  %v938_v5 = vld [vmem:[%s1283_s2 + $0xe8] sm:$0xff] }
   0x3   :  { %488 = vmatpush.bf16.msra.mxu0 %v916_v0  ;;  %575 = vmatpush.bf16.msra.mxu3 %v940_v2  ;;  %v913_v7 = vld [vmem:[%s1283_s2 + $0x20] sm:$0xff]  ;;  %v113_v8 = vld [vmem:[%s1284_s1 + $0x10] sm:$0xff]  ;;  %v912_v10 = vld [vmem:[%s1283_s2 + $0x18] sm:$0xff] }
   0x4   :  { %987 = vset.pattern.permute.xlu2 %v988_v6  ;;  %v937_v9 = vld [vmem:[%s1283_s2 + $0xe0] sm:$0xff]  ;;  %131 = vperm.xlu1 %986, %v113_v8   ;;  %v936_v12 = vld [vmem:[%s1283_s2 + $0xd8] sm:$0xff]  ;;  %v911_v13 = vld [vmem:[%s1283_s2 + $0x10] sm:$0xff] }
   0x5   :  { %v111_v11 = vld [vmem:[%s1284_s1] sm:$0xff]  ;;  %v114_v14 = vld [vmem:[%s1284_s1 + $0x18] sm:$0xff]  ;;  %v935_v15 = vld [vmem:[%s1283_s2 + $0xd0] sm:$0xff] }
   0x6   :  { %970 = vmatpush.bf16.msra.mxu1 %v915_v1  ;;  %971 = vmatpush.bf16.msra.mxu2 %v915_v1  ;;  %v910_v16 = vld [vmem:[%s1283_s2 + $0x8] sm:$0xff]  ;;  %v909_v19 = vld [vmem:[%s1283_s2] sm:$0xff]  ;;  %v896_v21 = vld [vmem:[%s1285_s0 + $0x38] sm:$0xf0] }
   0x7   :  { %489 = vmatpush.bf16.msra.mxu0 %v915_v1  ;;  %576 = vmatpush.bf16.msra.mxu3 %v939_v3  ;;  %v112_v17 = vld [vmem:[%s1284_s1 + $0x8] sm:$0xff]  ;;  %v723_v22 = vld [vmem:[%s1285_s0 + $0x78] sm:$0xf]  ;;  %v663_v26 = vld [vmem:[%s1285_s0] sm:$0xf] }
   0x8   :  { %121 = vperm.xlu0 %985, %v111_v11   ;;  %v934_v18 = vld [vmem:[%s1283_s2 + $0xc8] sm:$0xff]  ;;  %v932_v24 = vld [vmem:[%s1283_s2 + $0xb8] sm:$0xff]  ;;  %v933_v27 = vld [vmem:[%s1283_s2 + $0xc0] sm:$0xff] }
   0x9   :  { %v683_v20 = vld [vmem:[%s1285_s0 + $0x28] sm:$0xf]  ;;  %v906_v23 = vld [vmem:[%s1285_s0 + $0x88] sm:$0xf0]  ;;  %v924_v25 = vld [vmem:[%s1283_s2 + $0x78] sm:$0xff] }
   0xa   :  { %972 = vmatpush.bf16.msra.mxu1 %v914_v4  ;;  %973 = vmatpush.bf16.msra.mxu2 %v914_v4  ;;  %v684_v28 = vor.u32 %v896_v21, %v683_v20  ;;  %v724_v29 = vor.u32 %v906_v23, %v723_v22  ;;  %v891_v30 = vld [vmem:[%s1285_s0 + $0x10] sm:$0xf0]  ;;  %v890_v31 = vld [vmem:[%s1285_s0 + $0xc] sm:$0xf]  ;;  %v673_v32 = vld [vmem:[%s1285_s0 + $0x1c] sm:$0xf0] }
   0xb   :  { %490 = vmatpush.bf16.msra.mxu0 %v914_v4  ;;  %577 = vmatpush.bf16.msra.mxu3 %v938_v5  ;;  %v944_v33 = vld [vmem:[%s1283_s2 + $0x118] sm:$0xff]  ;;  %v931_v34 = vld [vmem:[%s1283_s2 + $0xb0] sm:$0xff]  ;;  %v664_v37 = vor.u32 %v891_v30, %v663_v26  ;;  %v676_v38 = vor.u32 %v890_v31, %v673_v32  ;;  %v930_v41 = vld [vmem:[%s1283_s2 + $0xa8] sm:$0xff] }
   0xc   :  { %136 = vperm.xlu1 %986, %v114_v14   ;;  %v923_v35 = vld [vmem:[%s1283_s2 + $0x70] sm:$0xff]  ;;  %v118_v36 = vld [vmem:[%s1284_s1 + $0x38] sm:$0xff]  ;;  %v922_v42 = vld [vmem:[%s1283_s2 + $0x68] sm:$0xff] }
   0xd   :  { %v943_v39 = vld [vmem:[%s1283_s2 + $0x110] sm:$0xff]  ;;  %v942_v43 = vld [vmem:[%s1283_s2 + $0x108] sm:$0xff]  ;;  %v929_v44 = vld [vmem:[%s1283_s2 + $0xa0] sm:$0xff] }
   0xe   :  { %974 = vmatpush.bf16.msra.mxu1 %v913_v7  ;;  %975 = vmatpush.bf16.msra.mxu2 %v913_v7  ;;  %v117_v40 = vld [vmem:[%s1284_s1 + $0x30] sm:$0xff]  ;;  %v921_v45 = vld [vmem:[%s1283_s2 + $0x60] sm:$0xff]  ;;  %v928_v49 = vld [vmem:[%s1283_s2 + $0x98] sm:$0xff] }
   0xf   :  { %491 = vmatpush.bf16.msra.mxu0 %v913_v7  ;;  %578 = vmatpush.bf16.msra.mxu3 %v937_v9  ;;  %v703_v46 = vld [vmem:[%s1285_s0 + $0x50] sm:$0xf]  ;;  %v901_v47 = vld [vmem:[%s1285_s0 + $0x60] sm:$0xf0]  ;;  %v920_v50 = vld [vmem:[%s1283_s2 + $0x58] sm:$0xff] }
  0x10   :  { %126 = vperm.xlu0 %985, %v112_v17   ;;  %v941_v48 = vld [vmem:[%s1283_s2 + $0x100] sm:$0xff]  ;;  %v679_v51 = vld [vmem:[%s1285_s0 + $0x10] sm:$0xf]  ;;  %v704_v52 = vor.u32 %v901_v47, %v703_v46  ;;  %v895_v54 = vld [vmem:[%s1285_s0 + $0x34] sm:$0xf] }
  0x11   :  { %v893_v53 = vld [vmem:[%s1285_s0 + $0x20] sm:$0xf0]  ;;  %v693_v55 = vld [vmem:[%s1285_s0 + $0x44] sm:$0xf0]  ;;  %v927_v56 = vld [vmem:[%s1283_s2 + $0x90] sm:$0xff] }
  0x12   :  { %976 = vmatpush.bf16.msra.mxu1 %v912_v10  ;;  %977 = vmatpush.bf16.msra.mxu2 %v912_v10  ;;  %v919_v57 = vld [vmem:[%s1283_s2 + $0x50] sm:$0xff]  ;;  %v680_v58 = vor.u32 %v893_v53, %v679_v51  ;;  %v696_v59 = vor.u32 %v895_v54, %v693_v55  ;;  %v115_v60 = vld [vmem:[%s1284_s1 + $0x20] sm:$0xff]  ;;  %v926_v61 = vld [vmem:[%s1283_s2 + $0x88] sm:$0xff] }
  0x13   :  { %492 = vmatpush.bf16.msra.mxu0 %v912_v10  ;;  %579 = vmatpush.bf16.msra.mxu3 %v936_v12  ;;  %v918_v62 = vld [vmem:[%s1283_s2 + $0x48] sm:$0xff]  ;;  %v925_v63 = vld [vmem:[%s1283_s2 + $0x80] sm:$0xff]  ;;  %v892_v2 = vld [vmem:[%s1285_s0 + $0x18] sm:$0xf0] }
  0x14   :  { %156 = vperm.xlu1 %986, %v118_v36   ;;  %141 = vperm.xlu2 %987, %v115_v60   ;;  %v917_v0 = vld [vmem:[%s1283_s2 + $0x40] sm:$0xff]  ;;  %v671_v1 = vld [vmem:[%s1285_s0 + $0x8] sm:$0xf]  ;;  %v665_v6 = vld [vmem:[%s1285_s0 + $0x14] sm:$0xf0] }
  0x15   :  { %v116_v3 = vld [vmem:[%s1284_s1 + $0x28] sm:$0xff]  ;;  %v672_v4 = vor.u32 %v892_v2, %v671_v1  ;;  %v889_v5 = vld [vmem:[%s1285_s0 + $0x4] sm:$0xf]  ;;  %v699_v7 = vld [vmem:[%s1285_s0 + $0x38] sm:$0xf] }
  0x16   :  { %978 = vmatpush.bf16.msra.mxu1 %v911_v13  ;;  %979 = vmatpush.bf16.msra.mxu2 %v911_v13  ;;  %v668_v8 = vor.u32 %v889_v5, %v665_v6  ;;  %v898_v9 = vld [vmem:[%s1285_s0 + $0x48] sm:$0xf0]  ;;  %v900_v10 = vld [vmem:[%s1285_s0 + $0x5c] sm:$0xf]  ;;  %v713_v11 = vld [vmem:[%s1285_s0 + $0x6c] sm:$0xf0] }
  0x17   :  { %493 = vmatpush.bf16.msra.mxu0 %v911_v13  ;;  %580 = vmatpush.bf16.msra.mxu3 %v935_v15  ;;  %v700_v12 = vor.u32 %v898_v9, %v699_v7  ;;  %v716_v13 = vor.u32 %v900_v10, %v713_v11  ;;  %v691_v14 = vld [vmem:[%s1285_s0 + $0x30] sm:$0xf]  ;;  %v897_v15 = vld [vmem:[%s1285_s0 + $0x40] sm:$0xf0]  ;;  %v894_v17 = vld [vmem:[%s1285_s0 + $0x2c] sm:$0xf] }
  0x18   :  { %151 = vperm.xlu0 %985, %v117_v40   ;;  %v903_v21 = vld [vmem:[%s1285_s0 + $0x70] sm:$0xf0]  ;;  %v905_v22 = vld [vmem:[%s1285_s0 + $0x84] sm:$0xf]  ;;  %v733_v23 = vld [vmem:[%s1285_s0 + $0x94] sm:$0xf0] }
  0x19   :  { %v711_v26 = vld [vmem:[%s1285_s0 + $0x58] sm:$0xf]  ;;  %v705_v30 = vld [vmem:[%s1285_s0 + $0x64] sm:$0xf0]  ;;  %v907_v36 = vld [vmem:[%s1285_s0 + $0x90] sm:$0xf0] }
  0x1a   :  { %980 = vmatpush.bf16.msra.mxu1 %v910_v16  ;;  %981 = vmatpush.bf16.msra.mxu2 %v910_v16  ;;  %v739_v32 = vld [vmem:[%s1285_s0 + $0x88] sm:$0xf] }
  0x1b   :  { %494 = vmatpush.bf16.msra.mxu0 %v910_v16  ;;  %581 = vmatpush.bf16.msra.mxu3 %v934_v18  ;;  %v692_v16 = vor.u32 %v897_v15, %v691_v14  ;;  %v685_v18 = vld [vmem:[%s1285_s0 + $0x3c] sm:$0xf0] }
  0x1c   :  { %146 = vperm.xlu2 %987, %v116_v3   ;;  %v688_v20 = vor.u32 %v894_v17, %v685_v18 }
  0x1e   :  { %982 = vmatpush.bf16.msra.mxu1 %v909_v19  ;;  %983 = vmatpush.bf16.msra.mxu2 %v909_v19 }
  0x1f   :  { %495 = vmatpush.bf16.msra.mxu0 %v909_v19  ;;  %582 = vmatpush.bf16.msra.mxu3 %v933_v27  ;;  %v719_v19 = vld [vmem:[%s1285_s0 + $0x60] sm:$0xf]  ;;  %v902_v27 = vld [vmem:[%s1285_s0 + $0x68] sm:$0xf0] }
  0x21   :  { %501 = vmatmul.bf16.vlgmr.msra.gmra.mxu1 %v684_v28  ;;  %511 = vmatmul.bf16.vlgmr.msra.gmra.mxu2 %v724_v29  ;;  %v712_v28 = vor.u32 %v902_v27, %v711_v26  ;;  %v899_v29 = vld [vmem:[%s1285_s0 + $0x54] sm:$0xf] }
  0x22   :  { %546 = vmatpush.bf16.msrb.mxu2 %v932_v24  ;;  %517 = vmatpush.bf16.msrb.mxu1 %v924_v25  ;;  %v720_v24 = vor.u32 %v903_v21, %v719_v19  ;;  %v736_v25 = vor.u32 %v905_v22, %v733_v23  ;;  %v708_v31 = vor.u32 %v899_v29, %v705_v30 }
  0x23   :  { %608 = vmatpush.bf16.msrb.mxu0 %v944_v33  ;;  %583 = vmatmul.bf16.vlgmr.msra.gmra.mxu3 %v676_v38  ;;  %v908_v33 = vld [vmem:[%s1285_s0 + $0x98] sm:$0xf0] }
  0x24   :  { %496 = vmatmul.bf16.vlgmr.msra.gmra.mxu0 %v664_v37  ;;  %v904_v38 = vld [vmem:[%s1285_s0 + $0x7c] sm:$0xf] }
  0x26   :  { %547 = vmatpush.bf16.msrb.mxu2 %v931_v34  ;;  %518 = vmatpush.bf16.msrb.mxu1 %v923_v35  ;;  %v740_v34 = vor.u32 %v908_v33, %v739_v32  ;;  %v731_v35 = vld [vmem:[%s1285_s0 + $0x80] sm:$0xf] }
  0x27   :  { %609 = vmatpush.bf16.msrb.mxu0 %v943_v39  ;;  %v732_v37 = vor.u32 %v907_v36, %v731_v35  ;;  %v725_v39 = vld [vmem:[%s1285_s0 + $0x8c] sm:$0xf0] }
  0x28   :  { %v728_v40 = vor.u32 %v904_v38, %v725_v39 }
  0x2a   :  { %548 = vmatpush.bf16.msrb.mxu2 %v930_v41  ;;  %519 = vmatpush.bf16.msrb.mxu1 %v922_v42 }
  0x2b   :  { %610 = vmatpush.bf16.msrb.mxu0 %v942_v43 }
  0x2e   :  { %549 = vmatpush.bf16.msrb.mxu2 %v929_v44  ;;  %520 = vmatpush.bf16.msrb.mxu1 %v921_v45 }
  0x2f   :  { %611 = vmatpush.bf16.msrb.mxu0 %v941_v48 }
  0x31   :  { %506 = vmatmul.bf16.gmra.mxu1 %v704_v52 }
  0x32   :  { %550 = vmatpush.bf16.msrb.mxu2 %v928_v49  ;;  %521 = vmatpush.bf16.msrb.mxu1 %v920_v50 }
  0x33   :  { %588 = vmatmul.bf16.gmra.mxu3 %v696_v59 }
  0x34   :  { %885 = vmatmul.msk.bf16.vlgmr.msrb.gmra.mxu0 %vm475_vm0, %v680_v58 }
  0x36   :  { %551 = vmatpush.bf16.msrb.mxu2 %v927_v56  ;;  %522 = vmatpush.bf16.msrb.mxu1 %v919_v57 }
  0x3a   :  { %552 = vmatpush.bf16.msrb.mxu2 %v926_v61  ;;  %523 = vmatpush.bf16.msrb.mxu1 %v918_v62 }
  0x3e   :  { %553 = vmatpush.bf16.msrb.mxu2 %v925_v63  ;;  %524 = vmatpush.bf16.msrb.mxu1 %v917_v0 }
  0x41   :  { %554 = vmatmul.bf16.vlgmr.msrb.gmra.mxu2 %v672_v4  ;;  %525 = vmatmul.bf16.vlgmr.msrb.gmra.mxu1 %v668_v8 }
  0x43   :  { %593 = vmatmul.bf16.gmra.mxu3 %v716_v13 }
  0x44   :  { %886 = vmatmul.msk.bf16.gmra.mxu0 %vm475_vm0, %v700_v12 }
  0x51   :  { %559 = vmatmul.bf16.gmra.mxu2 %v692_v16  ;;  %530 = vmatmul.bf16.gmra.mxu1 %v688_v20 }
  0x53   :  { %598 = vmatmul.bf16.gmra.mxu3 %v736_v25 }
  0x54   :  { %887 = vmatmul.msk.bf16.gmra.mxu0 %vm475_vm0, %v720_v24 }
  0x61   :  { %564 = vmatmul.bf16.gmra.mxu2 %v712_v28  ;;  %535 = vmatmul.bf16.gmra.mxu1 %v708_v31 }
  0x64   :  { %888 = vmatmul.msk.bf16.gmra.mxu0 %vm475_vm0, %v740_v34 }
  0x6e   :  { %v142_v22 = vpop.permute.xlu2 %141 }
  0x71   :  { %569 = vmatmul.bf16.gmra.mxu2 %v732_v37  ;;  %540 = vmatmul.bf16.gmra.mxu1 %v728_v40 }
  0x76   :  { %v132_v63 = vpop.permute.xlu1 %131  ;;  %v147_v37 = vpop.permute.xlu2 %146 }
  0x7a   :  { %v122_v51 = vpop.permute.xlu0 %121 }
  0x7e   :  { %v137_v14 = vpop.permute.xlu1 %136 }
  0x82   :  { %v127_v58 = vpop.permute.xlu0 %126 }
  0x9e   :  { %v502_v41 = vpop.f32.mrf.mxu1 }
  0x9f   :  { %v503_v7 = vadd.f32 %v502_v41, %v132_v63 }
  0xa1   :  { %v497_v42 = vpop.f32.mrf.mxu0 }
  0xa2   :  { %v498_v52 = vadd.f32 %v497_v42, %v122_v51  ;;  %v152_v51 = vpop.permute.xlu0 %151 }
  0xa4   :  { %v1265_v46 = vpop.f32.mrf.mxu2 }
  0xa6   :  { %v504_v43 = vpop.f32.mrf.mxu1  ;;  %v584_v47 = vpop.f32.mrf.mxu3 }
  0xa7   :  { %v505_v18 = vadd.f32 %v504_v43, %v137_v14 }
  0xa9   :  { %v499_v44 = vpop.f32.mrf.mxu0 }
  0xaa   :  { %v500_v60 = vadd.f32 %v499_v44, %v127_v58 }
  0xac   :  { %v1267_v50 = vpop.f32.mrf.mxu2 }
  0xae   :  { %v507_v45 = vpop.f32.mrf.mxu1  ;;  %v586_v54 = vpop.f32.mrf.mxu3 }
  0xaf   :  { %v508_v29 = vadd.f32 %v507_v45, %v142_v22 }
  0xb1   :  { %v613_v49 = vpop.f32.mrf.mxu0 }
  0xb6   :  { %v509_v48 = vpop.f32.mrf.mxu1  ;;  %v589_v2 = vpop.f32.mrf.mxu3 }
  0xb7   :  { %v510_v40 = vadd.f32 %v509_v48, %v147_v37  ;;  %v157_v48 = vpop.permute.xlu1 %156 }
  0xb9   :  { %v615_v57 = vpop.f32.mrf.mxu0 }
  0xbe   :  { %v526_v53 = vpop.f32.mrf.mxu1  ;;  %v591_v16 = vpop.f32.mrf.mxu3 }
  0xbf   :  { %v527_v55 = vadd.f32 %v526_v53, %v498_v52 }
  0xc1   :  { %v618_v4 = vpop.f32.mrf.mxu0 }
  0xc4   :  { %v555_v56 = vpop.f32.mrf.mxu2 }
  0xc5   :  { %v556_v59 = vadd.f32 %v555_v56, %v527_v55 }
  0xc6   :  { %v528_v61 = vpop.f32.mrf.mxu1  ;;  %v594_v28 = vpop.f32.mrf.mxu3 }
  0xc7   :  { %v529_v62 = vadd.f32 %v528_v61, %v500_v60  ;;  %v585_v0 = vadd.f32 %v584_v47, %v556_v59 }
  0xc9   :  { %v614_v5 = vadd.f32 %v613_v49, %v585_v0  ;;  %v620_v19 = vpop.f32.mrf.mxu0 }
  0xcb   :  { %v633_v10 = vmax.f32 %v614_v5, 0.0 }
  0xcc   :  { %v557_v1 = vpop.f32.mrf.mxu2 }
  0xcd   :  { %v558_v3 = vadd.f32 %v557_v1, %v529_v62  ;;  %v515_v1 = vadd.f32 %v1267_v50, %v157_v48 }
  0xce   :  { %v531_v9 = vpop.f32.mrf.mxu1  ;;  %v596_v42 = vpop.f32.mrf.mxu3 }
  0xcf   :  { %v587_v6 = vadd.f32 %v586_v54, %v558_v3  ;;  %v532_v12 = vadd.f32 %v531_v9, %v503_v7  ;;  %v513_v54 = vadd.f32 %v1265_v46, %v152_v51 }
  0xd1   :  { %v616_v8 = vadd.f32 %v615_v57, %v587_v6  ;;  %v623_v32 = vpop.f32.mrf.mxu0 }
  0xd3   :  { %v634_v11 = vmax.f32 %v616_v8, 0.0 }
  0xd4   :  { %v560_v13 = vpop.f32.mrf.mxu2 }
  0xd5   :  { %v948_v15 = vpack.c.bf16 %v634_v11, %v633_v10  ;;  %v561_v17 = vadd.f32 %v560_v13, %v532_v12 }
  0xd6   :  { %v533_v20 = vpop.f32.mrf.mxu1  ;;  %v599_v60 = vpop.f32.mrf.mxu3 }
  0xd7   :  { %949 = vst [vmem:[%s1286_s3] sm:$0xff] %v948_v15   ;;  %v534_v21 = vadd.f32 %v533_v20, %v505_v18  ;;  %v590_v23 = vadd.f32 %v589_v2, %v561_v17 }
  0xd9   :  { %v619_v26 = vadd.f32 %v618_v4, %v590_v23  ;;  %v625_v45 = vpop.f32.mrf.mxu0 }
  0xdb   :  { %v635_v33 = vmax.f32 %v619_v26, 0.0 }
  0xdc   :  { %v562_v24 = vpop.f32.mrf.mxu2 }
  0xdd   :  { %v563_v25 = vadd.f32 %v562_v24, %v534_v21 }
  0xde   :  { %v536_v31 = vpop.f32.mrf.mxu1  ;;  %v601_v6 = vpop.f32.mrf.mxu3 }
  0xdf   :  { %v592_v27 = vadd.f32 %v591_v16, %v563_v25  ;;  %v537_v35 = vadd.f32 %v536_v31, %v508_v29 }
  0xe1   :  { %v621_v30 = vadd.f32 %v620_v19, %v592_v27  ;;  %v628_v63 = vpop.f32.mrf.mxu0 }
  0xe3   :  { %v636_v34 = vmax.f32 %v621_v30, 0.0 }
  0xe4   :  { %v565_v36 = vpop.f32.mrf.mxu2 }
  0xe5   :  { %v953_v38 = vpack.c.bf16 %v636_v34, %v635_v33  ;;  %v566_v39 = vadd.f32 %v565_v36, %v537_v35 }
  0xe6   :  { %v538_v41 = vpop.f32.mrf.mxu1 }
  0xe7   :  { %965 = vst [vmem:[%s1286_s3 + $0x8] sm:$0xff] %v953_v38   ;;  %v539_v43 = vadd.f32 %v538_v41, %v510_v40  ;;  %v595_v44 = vadd.f32 %v594_v28, %v566_v39 }
  0xe9   :  { %v624_v52 = vadd.f32 %v623_v32, %v595_v44  ;;  %v630_v9 = vpop.f32.mrf.mxu0 }
  0xeb   :  { %v637_v57 = vmax.f32 %v624_v52, 0.0 }
  0xec   :  { %v567_v47 = vpop.f32.mrf.mxu2 }
  0xed   :  { %v568_v49 = vadd.f32 %v567_v47, %v539_v43 }
  0xee   :  { %v541_v56 = vpop.f32.mrf.mxu1 }
  0xef   :  { %v597_v53 = vadd.f32 %v596_v42, %v568_v49  ;;  %v542_v59 = vadd.f32 %v541_v56, %v513_v54 }
  0xf1   :  { %v626_v55 = vadd.f32 %v625_v45, %v597_v53 }
  0xf3   :  { %v638_v58 = vmax.f32 %v626_v55, 0.0 }
  0xf4   :  { %v570_v61 = vpop.f32.mrf.mxu2 }
  0xf5   :  { %v958_v62 = vpack.c.bf16 %v638_v58, %v637_v57  ;;  %v571_v0 = vadd.f32 %v570_v61, %v542_v59 }
  0xf6   :  { %v543_v2 = vpop.f32.mrf.mxu1 }
  0xf7   :  { %966 = vst [vmem:[%s1286_s3 + $0x10] sm:$0xff] %v958_v62   ;;  %v544_v3 = vadd.f32 %v543_v2, %v515_v1  ;;  %v600_v46 = vadd.f32 %v599_v60, %v571_v0 }
  0xf9   :  { %v629_v7 = vadd.f32 %v628_v63, %v600_v46 }
  0xfb   :  { %v639_v11 = vmax.f32 %v629_v7, 0.0 }
  0xfc   :  { %v572_v4 = vpop.f32.mrf.mxu2 }
  0xfd   :  { %v573_v5 = vadd.f32 %v572_v4, %v544_v3 }
  0xff   :  { %v602_v8 = vadd.f32 %v601_v6, %v573_v5 }
 0x101   :  { %v631_v10 = vadd.f32 %v630_v9, %v602_v8 }
 0x103   :  { %v640_v12 = vmax.f32 %v631_v10, 0.0 }
 0x105   :  { %v963_v13 = vpack.c.bf16 %v640_v12, %v639_v11 }
 0x107   :  { %967 = vst [vmem:[%s1286_s3 + $0x18] sm:$0xff] %v963_v13  }

</bundles_post_ra>
